<compile_context>
chip_gen: v6e
topology: v6e:2x2x1
jax: 0.10.0
libtpu: 0.0.40
codegen_flags: <defaults>
</compile_context>

<pallas_src>
import jax
import jax.numpy as jnp
from jax.experimental import pallas as pl
from jax.experimental.pallas import tpu as pltpu


# ----------------------------------------------------------------------------
# Path 1: resident-L kernel — one (B, L, C) slab per grid step, all in VMEM.
# ----------------------------------------------------------------------------
def _psa_resident_kernel(x_ref, wf_ref, wup_ref, wcomb_ref, o_ref):
    xb = x_ref[...]                                    # [B, L, C], native dtype
    B, L, C = xb.shape
    C2 = wup_ref.shape[0]

    # ---- fused projection (conv_v_right | conv_q_right): one MXU pass ------
    xf = xb.reshape(B * L, C)
    proj = jnp.dot(xf, wf_ref[...], preferred_element_type=jnp.float32)
    proj = proj.reshape(B, L, C2 + 1)
    input_x = proj[..., :C2]                           # [B, L, C2] (conv_v_right)
    cm = proj[..., C2:]                                # [B, L, 1]  (conv_q_right)

    # ---- spatial_pool: channel-only attention branch -----------------------
    # softmax over spatial positions; normalization folded into the pooled
    # [B, C2] context via an EUP reciprocal.
    p = jnp.exp(cm - jnp.max(cm, axis=1, keepdims=True))          # [B, L, 1]
    ctx = jnp.sum(input_x * p, axis=1)                            # [B, C2]
    ctx = ctx * pl.reciprocal(jnp.sum(p, axis=1), approx=True)    # [B, C2]
    mask_ch = jax.nn.sigmoid(
        jnp.dot(ctx, wup_ref[...], preferred_element_type=jnp.float32))  # [B, C]

    # ---- channel_pool: spatial-only attention branch (collapsed) -----------
    # score_l = <x_l @ wv_l, mean_L(x @ wq_l)> == <x_l, mean_L(x) @ W_comb>
    # with W_comb = wq_l @ wv_l^T precomputed wrapper-side.
    x_mean = jnp.mean(xb, axis=1, dtype=jnp.float32)              # [B, C] (f32 acc)
    w_eff = jnp.dot(x_mean, wcomb_ref[...],
                    preferred_element_type=jnp.float32)           # [B, C]
    w_eff = w_eff.astype(xb.dtype)
    score = jnp.sum(xb * w_eff[:, None, :], axis=2, keepdims=True,
                    dtype=jnp.float32)                            # [B, L, 1]
    q = jnp.exp(score - jnp.max(score, axis=1, keepdims=True))
    q = q * pl.reciprocal(jnp.sum(q, axis=1, keepdims=True), approx=True)
    mask_sp = jax.nn.sigmoid(q)                                   # [B, L, 1]

    # ---- fused gating: x*mask_ch + x*mask_sp == x*(mask_ch + mask_sp) ------
    gate = (mask_ch[:, None, :] + mask_sp).astype(xb.dtype)       # [B, L, C]
    o_ref[...] = (xb * gate).astype(o_ref.dtype)


# ----------------------------------------------------------------------------
# Path 2: L-tiled streaming kernel for large L*C (v7x 64 MiB VMEM).
# Grid = (N, 3 phases, L_tiles); x is re-streamed once per phase and only
# tiny per-sample stats live in scratch.
#   phase 0: online-softmax stats of the conv_q_right logits, softmax-weighted
#            conv_v_right context, running sum(x); finalize gate_ch and w_eff.
#   phase 1: running max/sum of the spatial-branch scores (need global mean).
#   phase 2: recompute scores per tile (cheaper than caching a lane-sparse
#            [L,1] buffer) and apply the fused gate.
# ----------------------------------------------------------------------------
def _psa_tiled_kernel(x_ref, wf_ref, wup_ref, wcomb_ref, o_ref,
                      mcm_sc, scm_sc, ctx_sc, xsum_sc,
                      msp_sc, ssp_sc, gch_sc, weff_sc):
    phase = pl.program_id(1)
    lt = pl.program_id(2)
    n_lt = pl.num_programs(2)
    C2 = wup_ref.shape[0]
    x = x_ref[0]                                       # [tl, C]
    inv_l = 1.0 / (x.shape[0] * n_lt)

    @pl.when(phase == 0)
    def _phase0():
        @pl.when(lt == 0)
        def _init():
            mcm_sc[...] = jnp.full_like(mcm_sc, -jnp.inf)
            scm_sc[...] = jnp.zeros_like(scm_sc)
            ctx_sc[...] = jnp.zeros_like(ctx_sc)
            xsum_sc[...] = jnp.zeros_like(xsum_sc)

        proj = jnp.dot(x, wf_ref[...], preferred_element_type=jnp.float32)
        iv = proj[:, :C2]                              # [tl, C2]
        cm = proj[:, C2:C2 + 1]                        # [tl, 1]
        m_old = mcm_sc[...]
        m_new = jnp.maximum(m_old, jnp.max(cm, axis=0, keepdims=True))
        alpha = jnp.exp(m_old - m_new)
        pexp = jnp.exp(cm - m_new)                     # [tl, 1]
        scm_sc[...] = alpha * scm_sc[...] + jnp.sum(pexp, axis=0, keepdims=True)
        ctx_sc[...] = alpha * ctx_sc[...] + jnp.sum(iv * pexp, axis=0,
                                                    keepdims=True)
        xsum_sc[...] = xsum_sc[...] + jnp.sum(x, axis=0, keepdims=True,
                                              dtype=jnp.float32)
        mcm_sc[...] = m_new

        @pl.when(lt == n_lt - 1)
        def _finalize():
            ctx = ctx_sc[...] * pl.reciprocal(scm_sc[...], approx=True)  # [1,C2]
            gch_sc[...] = jax.nn.sigmoid(
                jnp.dot(ctx, wup_ref[...], preferred_element_type=jnp.float32))
            x_mean = xsum_sc[...] * inv_l                                # [1, C]
            weff_sc[...] = jnp.dot(x_mean, wcomb_ref[...],
                                   preferred_element_type=jnp.float32)   # [1, C]

    @pl.when(phase == 1)
    def _phase1():
        @pl.when(lt == 0)
        def _init():
            msp_sc[...] = jnp.full_like(msp_sc, -jnp.inf)
            ssp_sc[...] = jnp.zeros_like(ssp_sc)
        w_eff = weff_sc[...].astype(x.dtype)
        score = jnp.sum(x * w_eff, axis=1, keepdims=True,
                        dtype=jnp.float32)                          # [tl, 1]
        m_old = msp_sc[...]
        m_new = jnp.maximum(m_old, jnp.max(score, axis=0, keepdims=True))
        alpha = jnp.exp(m_old - m_new)
        ssp_sc[...] = alpha * ssp_sc[...] + jnp.sum(jnp.exp(score - m_new),
                                                    axis=0, keepdims=True)
        msp_sc[...] = m_new

    @pl.when(phase == 2)
    def _phase2():
        w_eff = weff_sc[...].astype(x.dtype)
        score = jnp.sum(x * w_eff, axis=1, keepdims=True,
                        dtype=jnp.float32)                          # [tl, 1]
        q = jnp.exp(score - msp_sc[...]) * pl.reciprocal(ssp_sc[...],
                                                         approx=True)
        mask_sp = jax.nn.sigmoid(q)                                 # [tl, 1]
        gate = (gch_sc[...] + mask_sp).astype(x.dtype)              # [tl, C]
        o_ref[0] = (x * gate).astype(o_ref.dtype)


# ----------------------------------------------------------------------------
# VMEM budgeting helpers.
# ----------------------------------------------------------------------------
def _vmem_capacity_bytes():
    try:
        return int(pltpu.get_tpu_info().vmem_capacity_bytes)
    except Exception:
        return 64 * (1 << 20)   # conservative fallback: v7x has the smallest VMEM


def _est_resident_bytes(b, L, C, C2, itemsize):
    f32 = 4
    io = 4 * b * L * C * itemsize                 # double-buffered in + out blocks
    proj = 2 * b * L * (C2 + 1) * f32             # fused projection + slices
    gate = 3 * b * L * C * f32                    # gate broadcast / gated product
    cols = 5 * b * L * 128 * f32                  # [B, L, 1] columns (lane-padded)
    wts = 2 * (C * (C2 + 1) + C2 * C + C * C) * f32
    return io + proj + gate + cols + wts + (1 << 20)


def _est_tiled_bytes(tl, C, C2, itemsize):
    f32 = 4
    io = 4 * tl * C * itemsize
    tmp = 6 * tl * C * f32 + 2 * tl * (C2 + 1) * f32 + 4 * tl * 128 * f32
    return io + tmp + (2 << 20)


def _pick_l_tile(L, C, C2, itemsize, budget, requested=None):
    if (requested is not None and requested >= 8 and requested % 8 == 0
            and L % requested == 0):
        return requested
    cap = min(L, 4096)
    cap -= cap % 8
    for tl in range(cap, 7, -8):
        if L % tl == 0 and _est_tiled_bytes(tl, C, C2, itemsize) <= budget:
            return tl
    return None


# ----------------------------------------------------------------------------
# pallas_call wrappers.
# ----------------------------------------------------------------------------
def _psa_resident_call(x, w_fused, wup, w_comb, budget, vmem_cap):
    N, L, C = x.shape
    C2 = wup.shape[0]
    itemsize = jnp.dtype(x.dtype).itemsize

    # Per-step batch: big enough for roofline-sized DMAs (~2 MiB x blocks),
    # small enough for the VMEM budget, and >= 2 grid steps when N >= 2 so
    # both v7x TensorCores get work.
    per_sample = L * C * itemsize
    B = max(1, min(N, 64, (2 << 20) // max(per_sample, 1)))
    while B > 1 and _est_resident_bytes(B, L, C, C2, itemsize) > budget:
        B = max(1, B // 2)
    if N >= 2 and pl.cdiv(N, B) < 2:
        B = (N + 1) // 2

    grid = pl.cdiv(N, B)
    n_pad = grid * B
    x_in = x if n_pad == N else jnp.pad(x, ((0, n_pad - N), (0, 0), (0, 0)))

    est = _est_resident_bytes(B, L, C, C2, itemsize)
    vmem_limit = int(min(0.8 * vmem_cap, max(2 * est, 32 * (1 << 20))))

    def w_spec(arr):
        return pl.BlockSpec(arr.shape, lambda n: (0, 0))

    out = pl.pallas_call(
        _psa_resident_kernel,
        out_shape=jax.ShapeDtypeStruct((n_pad, L, C), x.dtype),
        grid_spec=pltpu.PrefetchScalarGridSpec(
            num_scalar_prefetch=0,
            grid=(grid,),
            in_specs=[
                pl.BlockSpec((B, L, C), lambda n: (n, 0, 0)),  # x slab
                w_spec(w_fused),       # [wv_r | wq_r]   ([C, C2+1])
                w_spec(wup),           # conv_up         ([C2, C])
                w_spec(w_comb),        # wq_l @ wv_l^T   ([C, C])
            ],
            out_specs=pl.BlockSpec((B, L, C), lambda n: (n, 0, 0)),
        ),
        compiler_params=pltpu.CompilerParams(
            dimension_semantics=("parallel",),
            vmem_limit_bytes=vmem_limit,
        ),
    )(x_in, w_fused, wup, w_comb)
    return out if n_pad == N else out[:N]


def _psa_tiled_call(x, w_fused, wup, w_comb, tl, vmem_cap):
    N, L, C = x.shape
    C2 = wup.shape[0]
    itemsize = jnp.dtype(x.dtype).itemsize
    n_lt = L // tl

    est = _est_tiled_bytes(tl, C, C2, itemsize)
    vmem_limit = int(min(0.8 * vmem_cap, max(2 * est, 32 * (1 << 20))))

    def w_spec(arr):
        return pl.BlockSpec(arr.shape, lambda n, p, l: (0, 0))

    f32 = jnp.float32
    return pl.pallas_call(
        _psa_tiled_kernel,
        out_shape=jax.ShapeDtypeStruct((N, L, C), x.dtype),
        grid_spec=pltpu.PrefetchScalarGridSpec(
            num_scalar_prefetch=0,
            grid=(N, 3, n_lt),   # (sample, phase, L tile)
            in_specs=[
                pl.BlockSpec((1, tl, C), lambda n, p, l: (n, l, 0)),
                w_spec(w_fused),
                w_spec(wup),
                w_spec(w_comb),
            ],
            # Output block index parks at (n, 0) during phases 0/1 (no garbage
            # write-backs); phase 2 walks the L tiles: l * (p // 2).
            out_specs=pl.BlockSpec((1, tl, C),
                                   lambda n, p, l: (n, l * (p // 2), 0)),
            scratch_shapes=[
                pltpu.VMEM((1, 1), f32),    # running max  (channel logits)
                pltpu.VMEM((1, 1), f32),    # running sum  (channel logits)
                pltpu.VMEM((1, C2), f32),   # running weighted context
                pltpu.VMEM((1, C), f32),    # running sum(x)
                pltpu.VMEM((1, 1), f32),    # running max  (spatial scores)
                pltpu.VMEM((1, 1), f32),    # running sum  (spatial scores)
                pltpu.VMEM((1, C), f32),    # finalized channel gate
                pltpu.VMEM((1, C), f32),    # finalized w_eff
            ],
        ),
        compiler_params=pltpu.CompilerParams(
            dimension_semantics=("parallel", "arbitrary", "arbitrary"),
            vmem_limit_bytes=vmem_limit,
        ),
    )(x, w_fused, wup, w_comb)


def psa_attention(x, params, *, force_tiled=False, l_tile=None):
    """PSA_p forward in NLC layout.  x: [N, L, C] -> [N, L, C]."""
    N, L, C = x.shape
    wv_r = params["wv_r"]            # [C, C2]  conv_v_right
    wq_r = params["wq_r"]            # [C, 1]   conv_q_right
    wup = params["wup"]              # [C2, C]  conv_up
    C2 = wv_r.shape[1]
    itemsize = jnp.dtype(x.dtype).itemsize

    # Fold the two right-branch projections into one lane-fuller weight and
    # collapse conv_q_left / conv_v_left into a single [C, C] weight.
    w_fused = jnp.concatenate([wv_r, wq_r], axis=1)                  # [C, C2+1]
    w_comb = jnp.dot(params["wq_l"], params["wv_l"].T)               # [C, C]

    vmem_cap = _vmem_capacity_bytes()
    budget = min(int(0.55 * vmem_cap), 96 * (1 << 20))

    use_tiled = force_tiled or _est_resident_bytes(1, L, C, C2, itemsize) > budget
    if use_tiled:
        tl = _pick_l_tile(L, C, C2, itemsize, budget, requested=l_tile)
        if tl is not None:
            return _psa_tiled_call(x, w_fused, wup, w_comb, tl, vmem_cap)
        # TODO(synk): no multiple-of-8 divisor tile of L fits the budget
        # (irregular L); fall through to the resident path with B=1.

    return _psa_resident_call(x, w_fused, wup, w_comb, budget, vmem_cap)


# ----------------------------------------------------------------------------
# Pure-JAX reference mirroring PSA_p semantics (NLC layout, bias-free convs).
# ----------------------------------------------------------------------------
def psa_reference(x, params):
    input_x = x @ params["wv_r"]                                   # [N, L, C2]
    cm = jax.nn.softmax(x @ params["wq_r"], axis=1)                # [N, L, 1]
    context = jnp.sum(input_x * cm, axis=1, keepdims=True)         # [N, 1, C2]
    mask_ch = jax.nn.sigmoid(context @ params["wup"])              # [N, 1, C]
    out_ch = x * mask_ch

    g_x = x @ params["wq_l"]                                       # [N, L, C2]
    avg_x = jnp.mean(g_x, axis=1, keepdims=True)                   # [N, 1, C2]
    theta_x = x @ params["wv_l"]                                   # [N, L, C2]
    ctx = jnp.sum(theta_x * avg_x, axis=2, keepdims=True)          # [N, L, 1]
    mask_sp = jax.nn.sigmoid(jax.nn.softmax(ctx, axis=1))
    out_sp = x * mask_sp
    return out_ch + out_sp


if __name__ == "__main__":
    # Shapes consistent with PSAAttention: embed_dims=64, hw_shape=(16, 16).
    N, H, W, C = 2, 16, 16, 64
    L = H * W
    C2 = C // 2                      # PSA_p inter_planes = planes // 2

    key = jax.random.PRNGKey(0)
    ks = jax.random.split(key, 7)
    params = {
        "wq_r": 0.1 * jax.random.normal(ks[1], (C, 1), dtype=jnp.float32),
        "wv_r": 0.1 * jax.random.normal(ks[2], (C, C2), dtype=jnp.float32),
        "wup":  0.1 * jax.random.normal(ks[3], (C2, C), dtype=jnp.float32),
        "wq_l": 0.1 * jax.random.normal(ks[4], (C, C2), dtype=jnp.float32),
        "wv_l": 0.1 * jax.random.normal(ks[5], (C, C2), dtype=jnp.float32),
    }

    x = jax.random.normal(ks[0], (N, L, C), dtype=jnp.float32)
    ref = psa_reference(x, params)

    # Primary (resident-L, batched) path.
    out = jax.block_until_ready(psa_attention(x, params))
    assert out.shape == (N, L, C)
    assert jnp.allclose(out, ref, atol=1e-3, rtol=1e-3), "resident path mismatch"

    # Odd batch -> exercises the N-padding + multi-sample-per-block logic.
    x5 = jax.random.normal(ks[6], (5, L, C), dtype=jnp.float32)
    out5 = jax.block_until_ready(psa_attention(x5, params))
    assert jnp.allclose(out5, psa_reference(x5, params), atol=1e-3, rtol=1e-3), \
        "batched/padded path mismatch"

    # L-tiled streaming path (auto-selected for large L*C, e.g. v7x); forced
    # here with a small tile to exercise the 3-phase online-softmax pipeline.
    out_t = jax.block_until_ready(
        psa_attention(x, params, force_tiled=True, l_tile=128))
    assert jnp.allclose(out_t, ref, atol=1e-3, rtol=1e-3), "tiled path mismatch"

    print("KERNEL_OK")
</pallas_src>

<mosaic_0001>
module attributes {stable_mosaic.version = 11 : i64} {
  func.func @_psa_resident_kernel(%arg0: i32, %arg1: memref<1x256x64xf32, #tpu.memory_space<vmem>>, %arg2: memref<64x33xf32, #tpu.memory_space<vmem>>, %arg3: memref<32x64xf32, #tpu.memory_space<vmem>>, %arg4: memref<64x64xf32, #tpu.memory_space<vmem>>, %arg5: memref<1x256x64xf32, #tpu.memory_space<vmem>>) attributes {dimension_semantics = [#tpu.dimension_semantics<parallel>], iteration_bounds = array<i64: 2>, scalar_prefetch = 0 : i64, scratch_operands = 0 : i64, tpu.core_type = #tpu.core_type<tc>, window_params = [{transform_indices = @transform_0, window_bounds = array<i64: 1, 256, 64>}, {pipeline_mode = #tpu.pipeline_mode<synchronous>, transform_indices = @transform_1, window_bounds = array<i64: 64, 33>}, {pipeline_mode = #tpu.pipeline_mode<synchronous>, transform_indices = @transform_2, window_bounds = array<i64: 32, 64>}, {pipeline_mode = #tpu.pipeline_mode<synchronous>, transform_indices = @transform_3, window_bounds = array<i64: 64, 64>}, {transform_indices = @transform_4, window_bounds = array<i64: 1, 256, 64>}]} {
    %c0 = arith.constant 0 : index
    %c0_0 = arith.constant 0 : index
    %c0_1 = arith.constant 0 : index
    %0 = vector.load %arg1[%c0, %c0_0, %c0_1] : memref<1x256x64xf32, #tpu.memory_space<vmem>>, vector<1x256x64xf32>
    %1 = vector.shape_cast %0 : vector<1x256x64xf32> to vector<256x64xf32>
    %c0_2 = arith.constant 0 : index
    %c0_3 = arith.constant 0 : index
    %2 = vector.load %arg2[%c0_2, %c0_3] : memref<64x33xf32, #tpu.memory_space<vmem>>, vector<64x33xf32>
    %cst = arith.constant dense<0.000000e+00> : vector<256x33xf32>
    %3 = tpu.matmul %1, %2, %cst {dimension_numbers = #tpu.dot_dimension_numbers<[1], [0], [0], [1], [0, 0, 1, 1], [], []>} : vector<256x64xf32>, vector<64x33xf32>, vector<256x33xf32> -> vector<256x33xf32>
    %4 = vector.shape_cast %3 : vector<256x33xf32> to vector<1x256x33xf32>
    %5 = vector.extract_strided_slice %4 {offsets = [0, 0, 0], sizes = [1, 256, 32], strides = [1, 1, 1]} : vector<1x256x33xf32> to vector<1x256x32xf32>
    %6 = vector.extract_strided_slice %4 {offsets = [0, 0, 32], sizes = [1, 256, 1], strides = [1, 1, 1]} : vector<1x256x33xf32> to vector<1x256x1xf32>
    %cst_4 = arith.constant dense<0xFF800000> : vector<1x1xf32>
    %7 = vector.multi_reduction <maximumf>, %6, %cst_4 [1] : vector<1x256x1xf32> to vector<1x1xf32>
    %8 = vector.shape_cast %7 : vector<1x1xf32> to vector<1x1x1xf32>
    %9 = vector.broadcast %8 : vector<1x1x1xf32> to vector<1x256x1xf32>
    %10 = arith.subf %6, %9 : vector<1x256x1xf32>
    %11 = math.exp %10 : vector<1x256x1xf32>
    %12 = vector.broadcast %11 : vector<1x256x1xf32> to vector<1x256x32xf32>
    %13 = arith.mulf %5, %12 : vector<1x256x32xf32>
    %cst_5 = arith.constant dense<0.000000e+00> : vector<1x32xf32>
    %14 = vector.multi_reduction <add>, %13, %cst_5 [1] : vector<1x256x32xf32> to vector<1x32xf32>
    %cst_6 = arith.constant dense<0.000000e+00> : vector<1x1xf32>
    %15 = vector.multi_reduction <add>, %11, %cst_6 [1] : vector<1x256x1xf32> to vector<1x1xf32>
    %16 = tpu.reciprocal %15 {approx = true} : vector<1x1xf32> -> vector<1x1xf32>
    %17 = vector.broadcast %16 : vector<1x1xf32> to vector<1x32xf32>
    %18 = arith.mulf %14, %17 : vector<1x32xf32>
    %c0_7 = arith.constant 0 : index
    %c0_8 = arith.constant 0 : index
    %19 = vector.load %arg3[%c0_7, %c0_8] : memref<32x64xf32, #tpu.memory_space<vmem>>, vector<32x64xf32>
    %cst_9 = arith.constant dense<0.000000e+00> : vector<1x64xf32>
    %20 = tpu.matmul %18, %19, %cst_9 {dimension_numbers = #tpu.dot_dimension_numbers<[1], [0], [0], [1], [0, 0, 1, 1], [], []>} : vector<1x32xf32>, vector<32x64xf32>, vector<1x64xf32> -> vector<1x64xf32>
    %21 = arith.negf %20 : vector<1x64xf32>
    %22 = math.exp %21 : vector<1x64xf32>
    %cst_10 = arith.constant 1.000000e+00 : f32
    %23 = vector.broadcast %cst_10 : f32 to vector<1x64xf32>
    %24 = arith.addf %23, %22 : vector<1x64xf32>
    %25 = arith.divf %23, %24 : vector<1x64xf32>
    %cst_11 = arith.constant dense<0.000000e+00> : vector<1x64xf32>
    %26 = vector.multi_reduction <add>, %0, %cst_11 [1] : vector<1x256x64xf32> to vector<1x64xf32>
    %cst_12 = arith.constant 2.560000e+02 : f32
    %27 = vector.broadcast %cst_12 : f32 to vector<1x64xf32>
    %28 = arith.divf %26, %27 : vector<1x64xf32>
    %c0_13 = arith.constant 0 : index
    %c0_14 = arith.constant 0 : index
    %29 = vector.load %arg4[%c0_13, %c0_14] : memref<64x64xf32, #tpu.memory_space<vmem>>, vector<64x64xf32>
    %cst_15 = arith.constant dense<0.000000e+00> : vector<1x64xf32>
    %30 = tpu.matmul %28, %29, %cst_15 {dimension_numbers = #tpu.dot_dimension_numbers<[1], [0], [0], [1], [0, 0, 1, 1], [], []>} : vector<1x64xf32>, vector<64x64xf32>, vector<1x64xf32> -> vector<1x64xf32>
    %31 = vector.shape_cast %30 : vector<1x64xf32> to vector<1x1x64xf32>
    %32 = vector.broadcast %31 : vector<1x1x64xf32> to vector<1x256x64xf32>
    %33 = arith.mulf %0, %32 : vector<1x256x64xf32>
    %cst_16 = arith.constant dense<0.000000e+00> : vector<1x256xf32>
    %34 = vector.multi_reduction <add>, %33, %cst_16 [2] : vector<1x256x64xf32> to vector<1x256xf32>
    %35 = vector.shape_cast %34 : vector<1x256xf32> to vector<1x256x1xf32>
    %cst_17 = arith.constant dense<0xFF800000> : vector<1x1xf32>
    %36 = vector.multi_reduction <maximumf>, %35, %cst_17 [1] : vector<1x256x1xf32> to vector<1x1xf32>
    %37 = vector.shape_cast %36 : vector<1x1xf32> to vector<1x1x1xf32>
    %38 = vector.broadcast %37 : vector<1x1x1xf32> to vector<1x256x1xf32>
    %39 = arith.subf %35, %38 : vector<1x256x1xf32>
    %40 = math.exp %39 : vector<1x256x1xf32>
    %cst_18 = arith.constant dense<0.000000e+00> : vector<1x1xf32>
    %41 = vector.multi_reduction <add>, %40, %cst_18 [1] : vector<1x256x1xf32> to vector<1x1xf32>
    %42 = vector.shape_cast %41 : vector<1x1xf32> to vector<1x1x1xf32>
    %43 = tpu.reciprocal %42 {approx = true} : vector<1x1x1xf32> -> vector<1x1x1xf32>
    %44 = vector.broadcast %43 : vector<1x1x1xf32> to vector<1x256x1xf32>
    %45 = arith.mulf %40, %44 : vector<1x256x1xf32>
    %46 = arith.negf %45 : vector<1x256x1xf32>
    %47 = math.exp %46 : vector<1x256x1xf32>
    %cst_19 = arith.constant 1.000000e+00 : f32
    %48 = vector.broadcast %cst_19 : f32 to vector<1x256x1xf32>
    %49 = arith.addf %48, %47 : vector<1x256x1xf32>
    %50 = arith.divf %48, %49 : vector<1x256x1xf32>
    %51 = vector.shape_cast %25 : vector<1x64xf32> to vector<1x1x64xf32>
    %52 = vector.broadcast %51 : vector<1x1x64xf32> to vector<1x256x64xf32>
    %53 = vector.broadcast %50 : vector<1x256x1xf32> to vector<1x256x64xf32>
    %54 = arith.addf %52, %53 : vector<1x256x64xf32>
    %55 = arith.mulf %0, %54 : vector<1x256x64xf32>
    %c0_20 = arith.constant 0 : index
    %c0_21 = arith.constant 0 : index
    %c0_22 = arith.constant 0 : index
    %56 = vector.load %arg5[%c0_20, %c0_21, %c0_22] : memref<1x256x64xf32, #tpu.memory_space<vmem>>, vector<1x256x64xf32>
    tpu.vector_store %arg5[%c0_20, %c0_21, %c0_22], %55 {strides = array<i32>} : memref<1x256x64xf32, #tpu.memory_space<vmem>>, vector<1x256x64xf32>,
    return
  }
  func.func @transform_0(%arg0: i32) -> (i32, i32, i32) {
    %c0_i32 = arith.constant 0 : i32
    %c0_i32_0 = arith.constant 0 : i32
    %c0_i32_1 = arith.constant 0 : i32
    return %arg0, %c0_i32, %c0_i32_0 : i32, i32, i32
  }
  func.func @transform_1(%arg0: i32) -> (i32, i32) {
    %c0_i32 = arith.constant 0 : i32
    %c0_i32_0 = arith.constant 0 : i32
    %c0_i32_1 = arith.constant 0 : i32
    return %c0_i32, %c0_i32_0 : i32, i32
  }
  func.func @transform_2(%arg0: i32) -> (i32, i32) {
    %c0_i32 = arith.constant 0 : i32
    %c0_i32_0 = arith.constant 0 : i32
    %c0_i32_1 = arith.constant 0 : i32
    return %c0_i32, %c0_i32_0 : i32, i32
  }
  func.func @transform_3(%arg0: i32) -> (i32, i32) {
    %c0_i32 = arith.constant 0 : i32
    %c0_i32_0 = arith.constant 0 : i32
    %c0_i32_1 = arith.constant 0 : i32
    return %c0_i32, %c0_i32_0 : i32, i32
  }
  func.func @transform_4(%arg0: i32) -> (i32, i32, i32) {
    %c0_i32 = arith.constant 0 : i32
    %c0_i32_0 = arith.constant 0 : i32
    %c0_i32_1 = arith.constant 0 : i32
    return %arg0, %c0_i32, %c0_i32_0 : i32, i32, i32
  }
}

</mosaic_0001>

<bundles_post_ra>
// kernel: tpu_custom_call.1
= control target key start
LH: loop header
LB: loop body
LE: loop exit
PB: predicated region body
PF: predicated region fallthrough
CT: control target
= control target key end

     0   :  { %s2601_s15 = smov 0   ;;  %s3740_s0 = inlined_call_operand.vmem [shape: f32[2,256,64], index: 0, kind: input, shape index: {}]   ;;  %s3741_s1 = inlined_call_operand.vmem [shape: f32[64,33], index: 1, kind: input, shape index: {}]   ;;  %s3742_s2 = inlined_call_operand.vmem [shape: f32[32,64], index: 2, kind: input, shape index: {}]   ;;  %s3743_s3 = inlined_call_operand.vmem [shape: f32[64,64], index: 3, kind: input, shape index: {}]   ;;  %s3744_s4 = inlined_call_operand.vmem [shape: f32[2,256,64], index: 4, kind: output, shape index: {}]  }
   0x1 LB: > { %s1981_s16 = sadd.s32 4294967295, %s2571_s15   ;;  %p1985_p0 = scmp.ge.s32.totalorder %s2571_s15, 1  ;;  %s2571_s15 = sphi %s2601_s15, %s14_s15  }
   0x2   : > { %p162_p1 = scmp.lt.s32.totalorder %s2571_s15, 3 }
   0x4   : > { %p163_p2 = pnand %p1985_p0, %p162_p1 }
   0x6   : > { %166 = sbr.rel (%p163_p2) target bundleno = 1147 (0x47b), region = 36 }
   0xb   : > { %v237_v0 = vld [vmem:[%s3741_s1 + $0x38] sm:$0xff]  ;;  %v236_v1 = vld [vmem:[%s3741_s1 + $0x30] sm:$0xff]  ;;  %p188_p3 = scmp.lt.s32.totalorder %s1981_s16, 1  ;;  %v235_v2 = vld [vmem:[%s3741_s1 + $0x28] sm:$0xff]  ;;  %vm238_vm0 = vcmask 523264   ;;  %v2573_v40 = vmov 32  }
   0xc   : > { %2115 = vmatprep.subr.mxu0 %v237_v0  ;;  %2209 = vmatprep.subr.mxu1 %v237_v0  ;;  %v234_v3 = vld [vmem:[%s3741_s1 + $0x20] sm:$0xff]  ;;  %v233_v4 = vld [vmem:[%s3741_s1 + $0x18] sm:$0xff]  ;;  %v232_v6 = vld [vmem:[%s3741_s1 + $0x10] sm:$0xff]  ;;  %vm560_vm1 = vcmask 269568   ;;  %vm2575_vm2 = vmmov 0   ;;  %vm918_vm3 = vcmask 261120  }
   0xd   : > { %2116 = vmatpush3.msra.mxu0 %v237_v0  ;;  %s3785_s16 = smov (!%p188_p3, %s1981_s16), 1  ;;  %2217 = vmatpush3.msra.mxu1 %v237_v0  ;;  %v231_v7 = vld [vmem:[%s3741_s1 + $0x8] sm:$0xff]  ;;  %v230_v8 = vld [vmem:[%s3741_s1] sm:$0xff] }
   0xe   : > { %2117 = vmatprep.subr.mxu0 %v236_v1  ;;  %2210 = vmatprep.subr.mxu1 %v236_v1  ;;  %s2059_s25 = sshll.u32 %s3785_s16, 8 }
   0xf   : > { %2118 = vmatpush3.msra.mxu0 %v236_v1  ;;  %2218 = vmatpush3.msra.mxu1 %v236_v1  ;;  %s2629_s28 = scalar_lea.vmem %s3740_s0, %s2059_s25  ;;  %s3601_s17 = scalar_lea.vmem %s3744_s4, %s2059_s25 }
  0x10   : > { %2119 = vmatprep.subr.mxu0 %v235_v2  ;;  %2211 = vmatprep.subr.mxu1 %v235_v2  ;;  %v2635_v5 = vld [vmem:[%s2629_s28] sm:$0xff]  ;;  %v2649_v9 = vld [vmem:[%s2629_s28 + $0x8] sm:$0xff]  ;;  %v2652_v10 = vld [vmem:[%s2629_s28 + $0x10] sm:$0xff] }
  0x11   : > { %2120 = vmatpush3.msra.mxu0 %v235_v2  ;;  %2219 = vmatpush3.msra.mxu1 %v235_v2  ;;  %v220_v11 = vld [vmem:[%s2629_s28 + $0xb0] sm:$0xff]  ;;  %v221_v12 = vld [vmem:[%s2629_s28 + $0xb8] sm:$0xff]  ;;  %v222_v13 = vld [vmem:[%s2629_s28 + $0xc0] sm:$0xff] }
  0x12   : > { %2121 = vmatprep.subr.mxu0 %v234_v3  ;;  %2131 = vmatprep.mubr.msk.f32.mxu0 %vm238_vm0, %v2635_v5  ;;  %v2662_v14 = vld [vmem:[%s2629_s28 + $0x18] sm:$0xff]  ;;  %v2666_v15 = vld [vmem:[%s2629_s28 + $0x20] sm:$0xff]  ;;  %v223_v16 = vld [vmem:[%s2629_s28 + $0xc8] sm:$0xff] }
  0x13   : > { %2122 = vmatpush3.msra.mxu0 %v234_v3  ;;  %2212 = vmatprep.subr.mxu1 %v234_v3  ;;  %v224_v17 = vld [vmem:[%s2629_s28 + $0xd0] sm:$0xff]  ;;  %v2677_v18 = vld [vmem:[%s2629_s28 + $0x28] sm:$0xff]  ;;  %v225_v20 = vld [vmem:[%s2629_s28 + $0xd8] sm:$0xff] }
  0x14   : > { %2123 = vmatprep.subr.mxu0 %v233_v4  ;;  %2220 = vmatpush3.msra.mxu1 %v234_v3  ;;  %v2680_v19 = vld [vmem:[%s2629_s28 + $0x30] sm:$0xff]  ;;  %v226_v21 = vld [vmem:[%s2629_s28 + $0xe0] sm:$0xff]  ;;  %v2691_v22 = vld [vmem:[%s2629_s28 + $0x38] sm:$0xff] }
  0x15   : > { %2124 = vmatpush3.msra.mxu0 %v233_v4  ;;  %2213 = vmatprep.subr.mxu1 %v233_v4  ;;  %v2694_v23 = vld [vmem:[%s2629_s28 + $0x40] sm:$0xff]  ;;  %v227_v24 = vld [vmem:[%s2629_s28 + $0xe8] sm:$0xff]  ;;  %v228_v25 = vld [vmem:[%s2629_s28 + $0xf0] sm:$0xff] }
  0x16   : > { %2125 = vmatprep.subr.mxu0 %v232_v6  ;;  %2221 = vmatpush3.msra.mxu1 %v233_v4  ;;  %v2705_v26 = vld [vmem:[%s2629_s28 + $0x48] sm:$0xff]  ;;  %v2708_v27 = vld [vmem:[%s2629_s28 + $0x50] sm:$0xff]  ;;  %v229_v28 = vld [vmem:[%s2629_s28 + $0xf8] sm:$0xff] }
  0x17   : > { %2126 = vmatpush3.msra.mxu0 %v232_v6  ;;  %2214 = vmatprep.subr.mxu1 %v232_v6  ;;  %3758 = vst [vmem:[#allocation2_spill] sm:$0xff] %v2705_v26  ;;  %3759 = vst [vmem:[#allocation3_spill] sm:$0xff] %v2708_v27  ;;  %v2718_v29 = vld [vmem:[%s2629_s28 + $0x58] sm:$0xff]  ;;  %v2721_v30 = vld [vmem:[%s2629_s28 + $0x60] sm:$0xff] }
  0x18   : > { %2127 = vmatprep.subr.mxu0 %v231_v7  ;;  %2222 = vmatpush3.msra.mxu1 %v232_v6  ;;  %3760 = vst [vmem:[#allocation4_spill] sm:$0xff] %v2718_v29  ;;  %3761 = vst [vmem:[#allocation5_spill] sm:$0xff] %v2721_v30  ;;  %v2729_v31 = vld [vmem:[%s2629_s28 + $0x68] sm:$0xff]  ;;  %v2732_v32 = vld [vmem:[%s2629_s28 + $0x70] sm:$0xff] }
  0x19   : > { %2128 = vmatpush3.msra.mxu0 %v231_v7  ;;  %2215 = vmatprep.subr.mxu1 %v231_v7  ;;  %3762 = vst [vmem:[#allocation6_spill] sm:$0xff] %v2729_v31  ;;  %3763 = vst [vmem:[#allocation7_spill] sm:$0xff] %v2732_v32  ;;  %v2739_v33 = vld [vmem:[%s2629_s28 + $0x78] sm:$0xff]  ;;  %v2742_v34 = vld [vmem:[%s2629_s28 + $0x80] sm:$0xff] }
  0x1a   : > { %2129 = vmatprep.subr.mxu0 %v230_v8  ;;  %2223 = vmatpush3.msra.mxu1 %v231_v7  ;;  %3764 = vst [vmem:[#allocation8_spill] sm:$0xff] %v2739_v33  ;;  %3765 = vst [vmem:[#allocation9_spill] sm:$0xff] %v2742_v34  ;;  %v2749_v35 = vld [vmem:[%s2629_s28 + $0x88] sm:$0xff]  ;;  %v2752_v36 = vld [vmem:[%s2629_s28 + $0x90] sm:$0xff] }
  0x1b   : > { %2130 = vmatpush3.msra.mxu0 %v230_v8  ;;  %2216 = vmatprep.subr.mxu1 %v230_v8  ;;  %3766 = vst [vmem:[#allocation10_spill] sm:$0xff] %v2749_v35  ;;  %3767 = vst [vmem:[#allocation11_spill] sm:$0xff] %v2752_v36  ;;  %v2759_v37 = vld [vmem:[%s2629_s28 + $0x98] sm:$0xff]  ;;  %v2762_v38 = vld [vmem:[%s2629_s28 + $0xa0] sm:$0xff] }
  0x1c   : > { %2132 = vmatmul.mubr.msk.f32.vlgmr.msra.gmra.mxu0 %vm238_vm0, %v2649_v9  ;;  %2224 = vmatpush3.msra.mxu1 %v230_v8  ;;  %3768 = vst [vmem:[#allocation12_spill] sm:$0xff] %v2759_v37  ;;  %3769 = vst [vmem:[#allocation13_spill] sm:$0xff] %v2762_v38  ;;  %v2769_v39 = vld [vmem:[%s2629_s28 + $0xa8] sm:$0xff] }
  0x1d   : > { %2134 = vmatprep.mubr.msk.f32.mxu0 %vm238_vm0, %v2652_v10  ;;  %2164 = vmatprep.mubr.msk.f32.mxu1 %vm238_vm0, %v220_v11  ;;  %3770 = vst [vmem:[#allocation14_spill] sm:$0xff] %v2769_v39 }
  0x1e   : > { %2165 = vmatmul.mubr.msk.f32.vlgmr.msra.gmra.mxu1 %vm238_vm0, %v221_v12  ;;  %2237 = vset.pattern.permute.xlu1 %v2573_v40 }
  0x1f   : > { %2167 = vmatprep.mubr.msk.f32.mxu1 %vm238_vm0, %v222_v13  ;;  %2236 = vset.pattern.permute.xlu0 %v2573_v40 }
  0x20   : > { %2135 = vmatmul.mubr.msk.f32.gmra.mxu0 %vm238_vm0, %v2662_v14 }
  0x21   : > { %2137 = vmatprep.mubr.msk.f32.mxu0 %vm238_vm0, %v2666_v15 }
  0x22   : > { %2168 = vmatmul.mubr.msk.f32.gmra.mxu1 %vm238_vm0, %v223_v16 }
  0x23   : > { %2170 = vmatprep.mubr.msk.f32.mxu1 %vm238_vm0, %v224_v17 }
  0x24   : > { %2138 = vmatmul.mubr.msk.f32.gmra.mxu0 %vm238_vm0, %v2677_v18 }
  0x25   : > { %2140 = vmatprep.mubr.msk.f32.mxu0 %vm238_vm0, %v2680_v19 }
  0x26   : > { %2171 = vmatmul.mubr.msk.f32.gmra.mxu1 %vm238_vm0, %v225_v20 }
  0x27   : > { %2173 = vmatprep.mubr.msk.f32.mxu1 %vm238_vm0, %v226_v21 }
  0x28   : > { %2141 = vmatmul.mubr.msk.f32.gmra.mxu0 %vm238_vm0, %v2691_v22 }
  0x29   : > { %2143 = vmatprep.mubr.msk.f32.mxu0 %vm238_vm0, %v2694_v23 }
  0x2a   : > { %2174 = vmatmul.mubr.msk.f32.gmra.mxu1 %vm238_vm0, %v227_v24 }
  0x2b   : > { %2176 = vmatprep.mubr.msk.f32.mxu1 %vm238_vm0, %v228_v25 }
  0x2c   : > { %2144 = vmatmul.mubr.msk.f32.gmra.mxu0 %vm238_vm0, %v2705_v26 }
  0x2d   : > { %2146 = vmatprep.mubr.msk.f32.mxu0 %vm238_vm0, %v2708_v27 }
  0x2e   : > { %2177 = vmatmul.mubr.msk.f32.gmra.mxu1 %vm238_vm0, %v229_v28 }
  0x30   : > { %2147 = vmatmul.mubr.msk.f32.gmra.mxu0 %vm238_vm0, %v2718_v29 }
  0x31   : > { %2149 = vmatprep.mubr.msk.f32.mxu0 %vm238_vm0, %v2721_v30 }
  0x34   : > { %2150 = vmatmul.mubr.msk.f32.gmra.mxu0 %vm238_vm0, %v2729_v31 }
  0x35   : > { %2152 = vmatprep.mubr.msk.f32.mxu0 %vm238_vm0, %v2732_v32 }
  0x38   : > { %2153 = vmatmul.mubr.msk.f32.gmra.mxu0 %vm238_vm0, %v2739_v33 }
  0x39   : > { %2155 = vmatprep.mubr.msk.f32.mxu0 %vm238_vm0, %v2742_v34 }
  0x3c   : > { %2156 = vmatmul.mubr.msk.f32.gmra.mxu0 %vm238_vm0, %v2749_v35 }
  0x3d   : > { %2158 = vmatprep.mubr.msk.f32.mxu0 %vm238_vm0, %v2752_v36 }
  0x40   : > { %2159 = vmatmul.mubr.msk.f32.gmra.mxu0 %vm238_vm0, %v2759_v37 }
  0x41   : > { %2161 = vmatprep.mubr.msk.f32.mxu0 %vm238_vm0, %v2762_v38 }
  0x44   : > { %2162 = vmatmul.mubr.msk.f32.gmra.mxu0 %vm238_vm0, %v2769_v39 }
  0xdc   : > { %v2773_v41 = vpop.f32.mrf.mxu0 }
  0xdd   : > { %v562_v6 = vsel %vm560_vm1, %v2773_v41, -inf }
  0xde   : > { %v2775_v42 = vpop.f32.mrf.mxu0  ;;  %v2779_v44 = vpop.f32.mrf.mxu1 }
  0xdf   : > { %v561_v40 = vsel %vm560_vm1, %v2775_v42, -inf }
  0xe0   : > { %v2777_v43 = vpop.f32.mrf.mxu0  ;;  %v2785_v47 = vpop.f32.mrf.mxu1 }
  0xe1   : > { %v564_v1 = vsel %vm560_vm1, %v2777_v43, -inf }
  0xe2   : > { %v2781_v45 = vpop.f32.mrf.mxu0  ;;  %v2791_v50 = vpop.f32.mrf.mxu1 }
  0xe3   : > { %v563_v7 = vsel %vm560_vm1, %v2781_v45, -inf }
  0xe4   : > { %v2783_v46 = vpop.f32.mrf.mxu0  ;;  %v2797_v53 = vpop.f32.mrf.mxu1 }
  0xe5   : > { %v567_v2 = vsel %vm560_vm1, %v2783_v46, -inf }
  0xe6   : > { %v2787_v48 = vpop.f32.mrf.mxu0  ;;  %v2803_v56 = vpop.f32.mrf.mxu1  ;;  %v568_v21 = vmax.f32 %v562_v6, %v567_v2 }
  0xe7   : > { %v565_v13 = vsel %vm560_vm1, %v2787_v48, -inf }
  0xe8   : > { %v2789_v49 = vpop.f32.mrf.mxu0  ;;  %v2809_v59 = vpop.f32.mrf.mxu1  ;;  %v566_v38 = vmax.f32 %v561_v40, %v565_v13 }
  0xe9   : > { %v571_v63 = vsel %vm560_vm1, %v2789_v49, -inf }
  0xea   : > { %v2793_v51 = vpop.f32.mrf.mxu0  ;;  %v2815_v62 = vpop.f32.mrf.mxu1  ;;  %v572_v8 = vmax.f32 %v564_v1, %v571_v63 }
  0xeb   : > { %v569_v3 = vsel %vm560_vm1, %v2793_v51, -inf }
  0xec   : > { %v2795_v52 = vpop.f32.mrf.mxu0  ;;  %v2835_v12 = vpop.f32.mrf.mxu1  ;;  %v570_v24 = vmax.f32 %v563_v7, %v569_v3 }
  0xed   : > { %v575_v16 = vsel %vm560_vm1, %v2795_v52, -inf }
  0xee   : > { %v2799_v54 = vpop.f32.mrf.mxu0  ;;  %v576_v37 = vmax.f32 %v568_v21, %v575_v16 }
  0xef   : > { %v573_v63 = vsel %vm560_vm1, %v2799_v54, -inf }
  0xf0   : > { %v2801_v55 = vpop.f32.mrf.mxu0  ;;  %v574_v35 = vmax.f32 %v566_v38, %v573_v63 }
  0xf1   : > { %v579_v4 = vsel %vm560_vm1, %v2801_v55, -inf }
  0xf2   : > { %v2805_v57 = vpop.f32.mrf.mxu0  ;;  %v580_v25 = vmax.f32 %v572_v8, %v579_v4  ;;  %v2857_v4 = vpop.f32.mrf.mxu1 }
  0xf3   : > { %v577_v17 = vsel %vm560_vm1, %v2805_v57, -inf }
  0xf4   : > { %v2807_v58 = vpop.f32.mrf.mxu0  ;;  %v578_v36 = vmax.f32 %v570_v24, %v577_v17  ;;  %v603_v17 = vsel %vm560_vm1, %v2779_v44, -inf }
  0xf5   : > { %v583_v1 = vsel %vm560_vm1, %v2807_v58, -inf }
  0xf6   : > { %v2811_v60 = vpop.f32.mrf.mxu0  ;;  %v584_v34 = vmax.f32 %v576_v37, %v583_v1  ;;  %v2875_v37 = vpop.f32.mrf.mxu1 }
  0xf7   : > { %v581_v6 = vsel %vm560_vm1, %v2811_v60, -inf }
  0xf8   : > { %v2813_v61 = vpop.f32.mrf.mxu0  ;;  %v582_v24 = vmax.f32 %v574_v35, %v581_v6 }
  0xf9   : > { %v587_v20 = vsel %vm560_vm1, %v2813_v61, -inf }
  0xfa   : > { %v2819_v0 = vpop.f32.mrf.mxu0  ;;  %v588_v2 = vmax.f32 %v580_v25, %v587_v20 }
  0xfb   : > { %v585_v39 = vsel %vm560_vm1, %v2819_v0, -inf }
  0xfc   : > { %v2833_v11 = vpop.f32.mrf.mxu0  ;;  %v586_v33 = vmax.f32 %v578_v36, %v585_v39  ;;  %v601_v36 = vsel %vm560_vm1, %v2785_v47, -inf  ;;  %v607_v39 = vsel %vm560_vm1, %v2791_v50, -inf }
  0xfd   : > { %v591_v7 = vsel %vm560_vm1, %v2833_v11, -inf }
  0xfe   : > { %v2845_v28 = vpop.f32.mrf.mxu0  ;;  %v592_v25 = vmax.f32 %v584_v34, %v591_v7  ;;  %v609_v34 = vsel %vm560_vm1, %v2809_v59, -inf  ;;  %v617_v7 = vsel %vm560_vm1, %v2875_v37, -inf }
  0xff   : > { %v589_v20 = vsel %vm560_vm1, %v2845_v28, -inf }
 0x100   : > { %v2855_v3 = vpop.f32.mrf.mxu0  ;;  %v590_v63 = vmax.f32 %v582_v24, %v589_v20 }
 0x101   : > { %v595_v8 = vsel %vm560_vm1, %v2855_v3, -inf }
 0x102   : > { %v596_v13 = vmax.f32 %v588_v2, %v595_v8  ;;  %v2865_v16 = vpop.f32.mrf.mxu0 }
 0x103   : > { %v593_v21 = vsel %vm560_vm1, %v2865_v16, -inf }
 0x104   : > { %v604_v40 = vmax.f32 %v596_v13, %v603_v17  ;;  %v594_v32 = vmax.f32 %v586_v33, %v593_v21  ;;  %v2873_v31 = vpop.f32.mrf.mxu0  ;;  %v611_v33 = vsel %vm560_vm1, %v2803_v56, -inf  ;;  %v619_v21 = vsel %vm560_vm1, %v2857_v4, -inf }
 0x105   : > { %v599_v38 = vsel %vm560_vm1, %v2873_v31, -inf }
 0x106   : > { %v602_v1 = vmax.f32 %v594_v32, %v601_v36  ;;  %v600_v2 = vmax.f32 %v592_v25, %v599_v38  ;;  %v2883_v35 = vpop.f32.mrf.mxu0  ;;  %v612_v17 = vmax.f32 %v604_v40, %v611_v33  ;;  %v605_v32 = vsel %vm560_vm1, %v2797_v53, -inf }
 0x107   : > { %v597_v6 = vsel %vm560_vm1, %v2883_v35, -inf  ;;  %v615_v36 = vsel %vm560_vm1, %v2815_v62, -inf  ;;  %v613_v38 = vsel %vm560_vm1, %v2835_v12, -inf }
 0x108   : > { %v608_v8 = vmax.f32 %v600_v2, %v607_v39  ;;  %v598_v13 = vmax.f32 %v590_v63, %v597_v6  ;;  %v610_v20 = vmax.f32 %v602_v1, %v609_v34  ;;  %v620_v39 = vmax.f32 %v612_v17, %v619_v21 }
 0x10a   : > { %v606_v24 = vmax.f32 %v598_v13, %v605_v32  ;;  %v618_v25 = vmax.f32 %v610_v20, %v617_v7  ;;  %v616_v30 = vmax.f32 %v608_v8, %v615_v36 }
 0x10c   : > { %v614_v29 = vmax.f32 %v606_v24, %v613_v38  ;;  %v622_v40 = vmax.f32 %v618_v25, %v620_v39 }
 0x10e   : > { %v621_v63 = vmax.f32 %v614_v29, %v616_v30 }
 0x110   : > { %v623_v1 = vmax.f32 %v621_v63, %v622_v40 }
 0x112   : > { %v624_v2 = vrot.slane %v623_v1, 4 }
 0x114   : > { %v625_v33 = vmax.f32 %v623_v1, %v624_v2 }
 0x116   : > { %v626_v34 = vrot.slane %v625_v33, 2 }
 0x118   : > { %v627_v6 = vmax.f32 %v625_v33, %v626_v34 }
 0x11a   : > { %v628_v27 = vrot.slane %v627_v6, 1 }
 0x11c   : > { %v2901_v26 = vmax.f32 %v627_v6, %v628_v27 }
 0x11e   : > { %v630_v7 = vsub.f32 %v2775_v42, %v2901_v26  ;;  %v631_v13 = vsub.f32 %v2773_v41, %v2901_v26  ;;  %v632_v8 = vsub.f32 %v2781_v45, %v2901_v26  ;;  %v633_v29 = vsub.f32 %v2777_v43, %v2901_v26 }
 0x11f   : > { %v634_v30 = vsub.f32 %v2787_v48, %v2901_v26  ;;  %v635_v27 = vsub.f32 %v2783_v46, %v2901_v26  ;;  %v636_v24 = vsub.f32 %v2793_v51, %v2901_v26  ;;  %v637_v36 = vsub.f32 %v2789_v49, %v2901_v26 }
 0x120   : > { %v662_v17 = vmul.f32 1.442695, %v630_v7  ;;  %v664_v20 = vmul.f32 1.442695, %v631_v13  ;;  %v666_v32 = vmul.f32 1.442695, %v632_v8  ;;  %v638_v39 = vsub.f32 %v2799_v54, %v2901_v26 }
 0x121   : > { %v668_v21 = vmul.f32 1.442695, %v633_v29  ;;  %v670_v25 = vmul.f32 1.442695, %v634_v30  ;;  %v672_v38 = vmul.f32 1.442695, %v635_v27  ;;  %v639_v40 = vsub.f32 %v2795_v52, %v2901_v26 }
 0x122   : > { %2238 = vpow2.f32 %v662_v17  ;;  %v674_v63 = vmul.f32 1.442695, %v636_v24  ;;  %v676_v1 = vmul.f32 1.442695, %v637_v36  ;;  %v640_v2 = vsub.f32 %v2805_v57, %v2901_v26 }
 0x123   : > { %2240 = vpow2.f32 %v664_v20  ;;  %v678_v33 = vmul.f32 1.442695, %v638_v39  ;;  %v641_v34 = vsub.f32 %v2801_v55, %v2901_v26  ;;  %v680_v6 = vmul.f32 1.442695, %v639_v40 }
 0x124   : > { %2242 = vpow2.f32 %v666_v32  ;;  %v642_v13 = vsub.f32 %v2811_v60, %v2901_v26  ;;  %v682_v8 = vmul.f32 1.442695, %v640_v2  ;;  %v643_v20 = vsub.f32 %v2807_v58, %v2901_v26 }
 0x125   : > { %2244 = vpow2.f32 %v668_v21  ;;  %v684_v32 = vmul.f32 1.442695, %v641_v34  ;;  %v645_v40 = vsub.f32 %v2813_v61, %v2901_v26 }
 0x126   : > { %2246 = vpow2.f32 %v670_v25  ;;  %v644_v25 = vsub.f32 %v2819_v0, %v2901_v26  ;;  %v686_v36 = vmul.f32 1.442695, %v642_v13 }
 0x127   : > { %2248 = vpow2.f32 %v672_v38 }
 0x128   : > { %2250 = vpow2.f32 %v674_v63 }
 0x129   : > { %2252 = vpow2.f32 %v676_v1  ;;  %v688_v1 = vmul.f32 1.442695, %v643_v20 }
 0x12a   : > { %2254 = vpow2.f32 %v678_v33 }
 0x12b   : > { %2256 = vpow2.f32 %v680_v6  ;;  %v646_v6 = vsub.f32 %v2845_v28, %v2901_v26 }
 0x12c   : > { %2258 = vpow2.f32 %v682_v8 }
 0x12d   : > { %2260 = vpow2.f32 %v684_v32 }
 0x12e   : > { %2262 = vpow2.f32 %v686_v36 }
 0x12f   : > { %v2239_v7 = vpop.eup %2238  ;;  %2264 = vpow2.f32 %v688_v1 }
 0x130   : > { %v2241_v29 = vpop.eup %2240  ;;  %v988_v30 = vsel %vm560_vm1, %v2239_v7, 0.0  ;;  %728 = vperm.xlu0 %2236, %v2239_v7   ;;  %v690_v7 = vmul.f32 1.442695, %v644_v25 }
 0x131   : > { %v2243_v17 = vpop.eup %2242  ;;  %v989_v27 = vsel %vm560_vm1, %v2241_v29, 0.0 }
 0x132   : > { %v2245_v21 = vpop.eup %2244  ;;  %v990_v24 = vadd.f32 %v989_v27, %v988_v30  ;;  %738 = vperm.xlu1 %2237, %v2243_v17   ;;  %v991_v38 = vsel %vm560_vm1, %v2243_v17, 0.0  ;;  %v692_v17 = vmul.f32 1.442695, %v645_v40  ;;  %2266 = vpow2.f32 %v690_v7 }
 0x133   : > { %v2247_v39 = vpop.eup %2246  ;;  %v993_v2 = vsel %vm560_vm1, %v2245_v21, 0.0 }
 0x134   : > { %v992_v63 = vadd.f32 %v991_v38, %v990_v24  ;;  %733 = vperm.xlu0 %2236, %v2241_v29   ;;  %v2249_v33 = vpop.eup %2248  ;;  %v995_v13 = vsel %vm560_vm1, %v2247_v39, 0.0  ;;  %v647_v29 = vsub.f32 %v2833_v11, %v2901_v26  ;;  %v694_v24 = vmul.f32 1.442695, %v646_v6 }
 0x135   : > { %v2251_v8 = vpop.eup %2250  ;;  %v997_v20 = vsel %vm560_vm1, %v2249_v33, 0.0  ;;  %2268 = vpow2.f32 %v692_v17 }
 0x136   : > { %v994_v34 = vadd.f32 %v993_v2, %v992_v63  ;;  %743 = vperm.xlu1 %2237, %v2245_v21   ;;  %v2253_v32 = vpop.eup %2252  ;;  %v648_v21 = vsub.f32 %v2865_v16, %v2901_v26  ;;  %v999_v25 = vsel %vm560_vm1, %v2251_v8, 0.0  ;;  %v696_v63 = vmul.f32 1.442695, %v647_v29 }
 0x137   : > { %v2255_v36 = vpop.eup %2254  ;;  %v1001_v40 = vsel %vm560_vm1, %v2253_v32, 0.0  ;;  %2270 = vpow2.f32 %v694_v24 }
 0x138   : > { %v996_v30 = vadd.f32 %v995_v13, %v994_v34  ;;  %748 = vperm.xlu0 %2236, %v2247_v39   ;;  %v649_v39 = vsub.f32 %v2855_v3, %v2901_v26  ;;  %v2257_v1 = vpop.eup %2256  ;;  %v698_v34 = vmul.f32 1.442695, %v648_v21  ;;  %v1003_v6 = vsel %vm560_vm1, %v2255_v36, 0.0 }
 0x139   : > { %v2259_v7 = vpop.eup %2258  ;;  %2272 = vpow2.f32 %v696_v63  ;;  %v1005_v29 = vsel %vm560_vm1, %v2257_v1, 0.0 }
 0x13a   : > { %v998_v27 = vadd.f32 %v997_v20, %v996_v30  ;;  %753 = vperm.xlu1 %2237, %v2249_v33   ;;  %v650_v33 = vsub.f32 %v2883_v35, %v2901_v26  ;;  %v700_v30 = vmul.f32 1.442695, %v649_v39  ;;  %v2261_v17 = vpop.eup %2260  ;;  %2274 = vpow2.f32 %v698_v34 }
 0x13b   : > { %v1007_v21 = vsel %vm560_vm1, %v2259_v7, 0.0  ;;  %v2263_v24 = vpop.eup %2262  ;;  %v1009_v39 = vsel %vm560_vm1, %v2261_v17, 0.0 }
 0x13c   : > { %v1000_v38 = vadd.f32 %v999_v25, %v998_v27  ;;  %758 = vperm.xlu0 %2236, %v2251_v8   ;;  %v651_v8 = vsub.f32 %v2873_v31, %v2901_v26  ;;  %v702_v27 = vmul.f32 1.442695, %v650_v33  ;;  %2276 = vpow2.f32 %v700_v30  ;;  %v2265_v63 = vpop.eup %2264 }
 0x13d   : > { %v1011_v33 = vsel %vm560_vm1, %v2263_v24, 0.0 }
 0x13e   : > { %v1002_v2 = vadd.f32 %v1001_v40, %v1000_v38  ;;  %763 = vperm.xlu1 %2237, %v2253_v32   ;;  %v652_v32 = vsub.f32 %v2785_v47, %v2901_v26  ;;  %v704_v38 = vmul.f32 1.442695, %v651_v8  ;;  %2278 = vpow2.f32 %v702_v27 }
 0x13f   : > { %v2267_v34 = vpop.eup %2266  ;;  %v1013_v8 = vsel %vm560_vm1, %v2265_v63, 0.0 }
 0x140   : > { %v1004_v13 = vadd.f32 %v1003_v6, %v1002_v2  ;;  %768 = vperm.xlu0 %2236, %v2255_v36   ;;  %v653_v36 = vsub.f32 %v2779_v44, %v2901_v26  ;;  %v706_v2 = vmul.f32 1.442695, %v652_v32  ;;  %2280 = vpow2.f32 %v704_v38 }
 0x141   : > { %v1015_v32 = vsel %vm560_vm1, %v2267_v34, 0.0 }
 0x142   : > { %v1006_v20 = vadd.f32 %v1005_v29, %v1004_v13  ;;  %773 = vperm.xlu1 %2237, %v2257_v1   ;;  %v654_v1 = vsub.f32 %v2797_v53, %v2901_v26  ;;  %v708_v13 = vmul.f32 1.442695, %v653_v36  ;;  %v2269_v30 = vpop.eup %2268  ;;  %2282 = vpow2.f32 %v706_v2 }
 0x143   : > { %v1017_v36 = vsel %vm560_vm1, %v2269_v30, 0.0 }
 0x144   : > { %v1008_v25 = vadd.f32 %v1007_v21, %v1006_v20  ;;  %778 = vperm.xlu0 %2236, %v2259_v7   ;;  %v655_v7 = vsub.f32 %v2791_v50, %v2901_v26  ;;  %v710_v20 = vmul.f32 1.442695, %v654_v1  ;;  %v2271_v27 = vpop.eup %2270  ;;  %2284 = vpow2.f32 %v708_v13 }
 0x145   : > { %v1019_v1 = vsel %vm560_vm1, %v2271_v27, 0.0 }
 0x146   : > { %v1010_v40 = vadd.f32 %v1009_v39, %v1008_v25  ;;  %783 = vperm.xlu1 %2237, %v2261_v17   ;;  %v656_v17 = vsub.f32 %v2809_v59, %v2901_v26  ;;  %v712_v25 = vmul.f32 1.442695, %v655_v7  ;;  %v2273_v38 = vpop.eup %2272  ;;  %2286 = vpow2.f32 %v710_v20 }
 0x147   : > { %v2275_v2 = vpop.eup %2274  ;;  %v1021_v7 = vsel %vm560_vm1, %v2273_v38, 0.0 }
 0x148   : > { %v1012_v6 = vadd.f32 %v1011_v33, %v1010_v40  ;;  %788 = vperm.xlu0 %2236, %v2263_v24   ;;  %v657_v24 = vsub.f32 %v2803_v56, %v2901_v26  ;;  %v714_v40 = vmul.f32 1.442695, %v656_v17  ;;  %2288 = vpow2.f32 %v712_v25 }
 0x149   : > { %v2277_v13 = vpop.eup %2276  ;;  %v1023_v17 = vsel %vm560_vm1, %v2275_v2, 0.0 }
 0x14a   : > { %v1014_v29 = vadd.f32 %v1013_v8, %v1012_v6  ;;  %793 = vperm.xlu1 %2237, %v2265_v63   ;;  %v658_v63 = vsub.f32 %v2835_v12, %v2901_v26  ;;  %v716_v6 = vmul.f32 1.442695, %v657_v24  ;;  %2290 = vpow2.f32 %v714_v40 }
 0x14b   : > { %v2279_v20 = vpop.eup %2278  ;;  %v1025_v24 = vsel %vm560_vm1, %v2277_v13, 0.0 }
 0x14c   : > { %v1016_v21 = vadd.f32 %v1015_v32, %v1014_v29  ;;  %798 = vperm.xlu0 %2236, %v2267_v34   ;;  %v659_v34 = vsub.f32 %v2815_v62, %v2901_v26  ;;  %v718_v29 = vmul.f32 1.442695, %v658_v63  ;;  %2292 = vpow2.f32 %v716_v6 }
 0x14d   : > { %v2281_v25 = vpop.eup %2280 }
 0x14e   : > { %v1018_v39 = vadd.f32 %v1017_v36, %v1016_v21  ;;  %803 = vperm.xlu1 %2237, %v2269_v30   ;;  %v660_v30 = vsub.f32 %v2875_v37, %v2901_v26  ;;  %v720_v21 = vmul.f32 1.442695, %v659_v34  ;;  %2294 = vpow2.f32 %v718_v29 }
 0x14f   : > { %v2283_v63 = vpop.eup %2282 }
 0x150   : > { %v1020_v33 = vadd.f32 %v1019_v1, %v1018_v39  ;;  %808 = vperm.xlu0 %2236, %v2271_v27   ;;  %v661_v27 = vsub.f32 %v2857_v4, %v2901_v26  ;;  %v1027_v39 = vsel %vm560_vm1, %v2279_v20, 0.0  ;;  %2296 = vpow2.f32 %v720_v21 }
 0x151   : > { %v1031_v34 = vsel %vm560_vm1, %v2283_v63, 0.0 }
 0x152   : > { %v1022_v8 = vadd.f32 %v1021_v7, %v1020_v33  ;;  %813 = vperm.xlu1 %2237, %v2273_v38   ;;  %v722_v38 = vmul.f32 1.442695, %v660_v30  ;;  %v724_v1 = vmul.f32 1.442695, %v661_v27  ;;  %v2285_v33 = vpop.eup %2284 }
 0x153   : > { %v2287_v6 = vpop.eup %2286 }
 0x154   : > { %v1024_v32 = vadd.f32 %v1023_v17, %v1022_v8  ;;  %818 = vperm.xlu0 %2236, %v2275_v2   ;;  %v1029_v2 = vsel %vm560_vm1, %v2281_v25, 0.0  ;;  %2298 = vpow2.f32 %v722_v38  ;;  %v1035_v29 = vsel %vm560_vm1, %v2287_v6, 0.0 }
 0x155   : > { %2300 = vpow2.f32 %v724_v1  ;;  %v2289_v8 = vpop.eup %2288 }
 0x156   : > { %v1026_v36 = vadd.f32 %v1025_v24, %v1024_v32  ;;  %823 = vperm.xlu1 %2237, %v2277_v13   ;;  %v1033_v13 = vsel %vm560_vm1, %v2285_v33, 0.0  ;;  %v1037_v32 = vsel %vm560_vm1, %v2289_v8, 0.0 }
 0x157   : > { %v2291_v17 = vpop.eup %2290 }
 0x158   : > { %v1028_v40 = vadd.f32 %v1027_v39, %v1026_v36  ;;  %828 = vperm.xlu0 %2236, %v2279_v20   ;;  %v1039_v24 = vsel %vm560_vm1, %v2291_v17, 0.0 }
 0x159   : > { %v2293_v27 = vpop.eup %2292 }
 0x15a   : > { %v1030_v26 = vadd.f32 %v1029_v2, %v1028_v40  ;;  %833 = vperm.xlu1 %2237, %v2281_v25   ;;  %v1041_v38 = vsel %vm560_vm1, %v2293_v27, 0.0 }
 0x15b   : > { %v2295_v25 = vpop.eup %2294 }
 0x15c   : > { %v1032_v7 = vadd.f32 %v1031_v34, %v1030_v26  ;;  %838 = vperm.xlu0 %2236, %v2283_v63   ;;  %v1043_v40 = vsel %vm560_vm1, %v2295_v25, 0.0 }
 0x15d   : > { %v2297_v39 = vpop.eup %2296 }
 0x15e   : > { %v1034_v30 = vadd.f32 %v1033_v13, %v1032_v7  ;;  %843 = vperm.xlu1 %2237, %v2285_v33   ;;  %v1045_v33 = vsel %vm560_vm1, %v2297_v39, 0.0 }
 0x160   : > { %v1036_v20 = vadd.f32 %v1035_v29, %v1034_v30  ;;  %848 = vperm.xlu0 %2236, %v2287_v6   ;;  %v1067_v29 = vld [vmem:[%s3742_s2 + $0x18] sm:$0xff] }
 0x161   : > { %v2299_v1 = vpop.eup %2298 }
 0x162   : > { %v1038_v21 = vadd.f32 %v1037_v32, %v1036_v20  ;;  %853 = vperm.xlu1 %2237, %v2289_v8   ;;  %v2301_v26 = vpop.eup %2300  ;;  %v1047_v6 = vsel %vm560_vm1, %v2299_v1, 0.0  ;;  %v2574_v20 = vmov 0.0   ;;  %v1066_v32 = vld [vmem:[%s3742_s2 + $0x10] sm:$0xff] }
 0x163   : > { %v1049_v13 = vsel %vm560_vm1, %v2301_v26, 0.0  ;;  %2179 = vmatprep.subr.mxu1 %v2574_v20  ;;  %2187 = vmatprep.mubr.msk.f32.mxu1 %vm2575_vm2, %v2574_v20 }
 0x164   : > { %v1040_v36 = vadd.f32 %v1039_v24, %v1038_v21  ;;  %858 = vperm.xlu0 %2236, %v2291_v17   ;;  %2180 = vmatpush3.msra.mxu1 %v1067_v29  ;;  %v1065_v21 = vld [vmem:[%s3742_s2 + $0x8] sm:$0xff] }
 0x165   : > { %2181 = vmatprep.subr.mxu1 %v2574_v20 }
 0x166   : > { %v1042_v63 = vadd.f32 %v1041_v38, %v1040_v36  ;;  %863 = vperm.xlu1 %2237, %v2293_v27   ;;  %2182 = vmatpush3.msra.mxu1 %v1066_v32 }
 0x167   : > { %2183 = vmatprep.subr.mxu1 %v2574_v20 }
 0x168   : > { %v1044_v2 = vadd.f32 %v1043_v40, %v1042_v63  ;;  %868 = vperm.xlu0 %2236, %v2295_v25   ;;  %v1064_v25 = vld [vmem:[%s3742_s2] sm:$0xff]  ;;  %2184 = vmatpush3.msra.mxu1 %v1065_v21  ;;  %v1148_v63 = vsel %vm238_vm0, %v2649_v9, 0.0  ;;  %v1156_v9 = vsel %vm238_vm0, %v2677_v18, 0.0 }
 0x169   : > { %2185 = vmatprep.subr.mxu1 %v2574_v20 }
 0x16a   : > { %v1046_v34 = vadd.f32 %v1045_v33, %v1044_v2  ;;  %873 = vperm.xlu1 %2237, %v2297_v39   ;;  %2186 = vmatpush3.msra.mxu1 %v1064_v25  ;;  %v1147_v39 = vsel %vm238_vm0, %v2635_v5, 0.0  ;;  %v1152_v33 = vsel %vm238_vm0, %v2662_v14, 0.0  ;;  %v1154_v5 = vsel %vm238_vm0, %v2666_v15, 0.0 }
 0x16b   : > { %2190 = vmatprep.subr.mxu1 %v2574_v20  ;;  %v1149_v40 = vadd.f32 %v1148_v63, %v1147_v39  ;;  %v1160_v14 = vsel %vm238_vm0, %v2691_v22, 0.0  ;;  %v3775_v63 = vld [vmem:[#allocation6_spill] sm:$0xff] }
 0x16c   : > { %v1048_v7 = vadd.f32 %v1047_v6, %v1046_v34  ;;  %878 = vperm.xlu0 %2236, %v2299_v1   ;;  %v1150_v1 = vsel %vm238_vm0, %v2652_v10, 0.0  ;;  %v1158_v10 = vsel %vm238_vm0, %v2680_v19, 0.0 }
 0x16d   : > { %v1151_v2 = vadd.f32 %v1150_v1, %v1149_v40 }
 0x16e   : > { %v1050_v8 = vadd.f32 %v1049_v13, %v1048_v7  ;;  %883 = vperm.xlu1 %2237, %v2301_v26  }
 0x16f   : > { %v1153_v26 = vadd.f32 %v1152_v33, %v1151_v2 }
 0x170   : > { %v1051_v30 = vrot.slane %v1050_v8, 4 }
 0x171   : > { %v1155_v6 = vadd.f32 %v1154_v5, %v1153_v26  ;;  %v3776_v5 = vld [vmem:[#allocation7_spill] sm:$0xff] }
 0x172   : > { %v1052_v17 = vadd.f32 %v1051_v30, %v1050_v8  ;;  %v1162_v30 = vsel %vm238_vm0, %v2694_v23, 0.0  ;;  %v1172_v23 = vsel %vm238_vm0, %v3775_v63, 0.0 }
 0x173   : > { %v1157_v7 = vadd.f32 %v1156_v9, %v1155_v6  ;;  %v1174_v6 = vsel %vm238_vm0, %v3776_v5, 0.0 }
 0x174   : > { %v1053_v27 = vrot.slane %v1052_v17, 2 }
 0x175   : > { %v1159_v13 = vadd.f32 %v1158_v10, %v1157_v7 }
 0x176   : > { %v1054_v24 = vadd.f32 %v1053_v27, %v1052_v17  ;;  %v3771_v17 = vld [vmem:[#allocation2_spill] sm:$0xff]  ;;  %v3772_v27 = vld [vmem:[#allocation3_spill] sm:$0xff] }
 0x177   : > { %v1161_v8 = vadd.f32 %v1160_v14, %v1159_v13  ;;  %v1164_v15 = vsel %vm238_vm0, %v3771_v17, 0.0  ;;  %v1166_v18 = vsel %vm238_vm0, %v3772_v27, 0.0 }
 0x178   : > { %v1055_v36 = vrot.slane %v1054_v24, 1 }
 0x179   : > { %v1163_v29 = vadd.f32 %v1162_v30, %v1161_v8 }
 0x17a   : > { %v1056_v38 = vadd.f32 %v1055_v36, %v1054_v24  ;;  %v3773_v24 = vld [vmem:[#allocation4_spill] sm:$0xff]  ;;  %v3774_v36 = vld [vmem:[#allocation5_spill] sm:$0xff] }
 0x17b   : > { %v1165_v32 = vadd.f32 %v1164_v15, %v1163_v29  ;;  %v1168_v19 = vsel %vm238_vm0, %v3773_v24, 0.0  ;;  %v1170_v22 = vsel %vm238_vm0, %v3774_v36, 0.0 }
 0x17c   : > { %2302 = vrcp.f32 %v1056_v38 }
 0x17d   : > { %v1167_v21 = vadd.f32 %v1166_v18, %v1165_v32 }
 0x17f   : > { %v1169_v25 = vadd.f32 %v1168_v19, %v1167_v21 }
 0x181   : > { %v1171_v39 = vadd.f32 %v1170_v22, %v1169_v25  ;;  %v3778_v25 = vld [vmem:[#allocation9_spill] sm:$0xff] }
 0x182   : > { %v1178_v36 = vsel %vm238_vm0, %v3778_v25, 0.0 }
 0x183   : > { %v1173_v33 = vadd.f32 %v1172_v23, %v1171_v39 }
 0x189   : > { %v2303_v34 = vpop.eup %2302 }
 0x18a   : > { %1060 = vperm.xlu0 %2236, %v2303_v34  }
 0x1ab   : > { %v729_v38 = vpop.permute.xlu0 %728 }
 0x1ac   : > { %v886_v1 = vmul.f32 %v729_v38, %v2775_v42  ;;  %v1175_v42 = vadd.f32 %v1174_v6, %v1173_v33 }
 0x1ad   : > { %v739_v40 = vpop.permute.xlu1 %738 }
 0x1ae   : > { %v888_v26 = vmul.f32 %v739_v40, %v2781_v45  ;;  %v919_v7 = vsel %vm918_vm3, %v886_v1, 0.0  ;;  %v3777_v45 = vld [vmem:[#allocation8_spill] sm:$0xff] }
 0x1af   : > { %v734_v2 = vpop.permute.xlu0 %733 }
 0x1b0   : > { %v887_v34 = vmul.f32 %v2773_v41, %v734_v2  ;;  %v922_v30 = vsel %vm918_vm3, %v888_v26, 0.0  ;;  %v1176_v41 = vsel %vm238_vm0, %v3777_v45, 0.0  ;;  %v3779_v2 = vld [vmem:[#allocation10_spill] sm:$0xff] }
 0x1b1   : > { %v744_v9 = vpop.permute.xlu1 %743  ;;  %v1177_v21 = vadd.f32 %v1176_v41, %v1175_v42  ;;  %v1180_v33 = vsel %vm238_vm0, %v3779_v2, 0.0 }
 0x1b2   : > { %v889_v10 = vmul.f32 %v2777_v43, %v744_v9  ;;  %v920_v13 = vsel %vm918_vm3, %v887_v34, 0.0 }
 0x1b3   : > { %v921_v14 = vadd.f32 %v920_v13, %v919_v7  ;;  %v749_v8 = vpop.permute.xlu0 %748  ;;  %v1179_v40 = vadd.f32 %v1178_v36, %v1177_v21  ;;  %v3780_v13 = vld [vmem:[#allocation11_spill] sm:$0xff]  ;;  %v3782_v36 = vld [vmem:[#allocation13_spill] sm:$0xff] }
 0x1b4   : > { %v890_v29 = vmul.f32 %v749_v8, %v2787_v48  ;;  %v924_v32 = vsel %vm918_vm3, %v889_v10, 0.0 }
 0x1b5   : > { %v923_v17 = vadd.f32 %v922_v30, %v921_v14  ;;  %v754_v15 = vpop.permute.xlu1 %753  ;;  %v1181_v7 = vadd.f32 %v1180_v33, %v1179_v40  ;;  %v1182_v14 = vsel %vm238_vm0, %v3780_v13, 0.0 }
 0x1b6   : > { %v891_v27 = vmul.f32 %v2783_v46, %v754_v15  ;;  %v926_v24 = vsel %vm918_vm3, %v890_v29, 0.0  ;;  %v3781_v15 = vld [vmem:[#allocation12_spill] sm:$0xff] }
 0x1b7   : > { %v925_v18 = vadd.f32 %v924_v32, %v923_v17  ;;  %v759_v43 = vpop.permute.xlu0 %758  ;;  %v1183_v41 = vadd.f32 %v1182_v14, %v1181_v7  ;;  %v1184_v32 = vsel %vm238_vm0, %v3781_v15, 0.0  ;;  %v3099_v7 = vld [vmem:[%s2629_s28 + $0xb0] sm:$0xff] }
 0x1b8   : > { %v892_v19 = vmul.f32 %v759_v43, %v2793_v51  ;;  %v928_v38 = vsel %vm918_vm3, %v891_v27, 0.0 }
 0x1b9   : > { %v927_v48 = vadd.f32 %v926_v24, %v925_v18  ;;  %v764_v22 = vpop.permute.xlu1 %763 }
 0x1ba   : > { %v893_v39 = vmul.f32 %v2789_v49, %v764_v22  ;;  %v930_v46 = vsel %vm918_vm3, %v892_v19, 0.0  ;;  %v1185_v19 = vadd.f32 %v1184_v32, %v1183_v41 }
 0x1bb   : > { %v929_v63 = vadd.f32 %v928_v38, %v927_v48  ;;  %v769_v23 = vpop.permute.xlu0 %768  ;;  %v1186_v48 = vsel %vm238_vm0, %v3782_v36, 0.0 }
 0x1bc   : > { %v894_v1 = vmul.f32 %v769_v23, %v2799_v54  ;;  %v932_v34 = vsel %vm918_vm3, %v893_v39, 0.0 }
 0x1bd   : > { %v931_v51 = vadd.f32 %v930_v46, %v929_v63  ;;  %v774_v26 = vpop.permute.xlu1 %773 }
 0x1be   : > { %v895_v5 = vmul.f32 %v2795_v52, %v774_v26  ;;  %v934_v49 = vsel %vm918_vm3, %v894_v1, 0.0  ;;  %v3783_v1 = vld [vmem:[#allocation14_spill] sm:$0xff] }
 0x1bf   : > { %v933_v6 = vadd.f32 %v932_v34, %v931_v51  ;;  %v779_v9 = vpop.permute.xlu0 %778 }
 0x1c0   : > { %v896_v10 = vmul.f32 %v779_v9, %v2805_v57  ;;  %v936_v42 = vsel %vm918_vm3, %v895_v5, 0.0 }
 0x1c1   : > { %v935_v54 = vadd.f32 %v934_v49, %v933_v6  ;;  %v784_v8 = vpop.permute.xlu1 %783 }
 0x1c2   : > { %v897_v30 = vmul.f32 %v2801_v55, %v784_v8  ;;  %v938_v52 = vsel %vm918_vm3, %v896_v10, 0.0 }
 0x1c3   : > { %v937_v29 = vadd.f32 %v936_v42, %v935_v54  ;;  %v789_v45 = vpop.permute.xlu0 %788 }
 0x1c4   : > { %v898_v17 = vmul.f32 %v789_v45, %v2811_v60  ;;  %v940_v18 = vsel %vm918_vm3, %v897_v30, 0.0 }
 0x1c5   : > { %v939_v57 = vadd.f32 %v938_v52, %v937_v29  ;;  %v794_v27 = vpop.permute.xlu1 %793 }
 0x1c6   : > { %v899_v43 = vmul.f32 %v2807_v58, %v794_v27  ;;  %v942_v55 = vsel %vm918_vm3, %v898_v17, 0.0  ;;  %v1187_v58 = vadd.f32 %v1186_v48, %v1185_v19 }
 0x1c7   : > { %v941_v21 = vadd.f32 %v940_v18, %v939_v57  ;;  %v799_v24 = vpop.permute.xlu0 %798 }
 0x1c8   : > { %v900_v25 = vmul.f32 %v799_v24, %v2819_v0  ;;  %v944_v38 = vsel %vm918_vm3, %v899_v43, 0.0  ;;  %v1188_v0 = vsel %vm238_vm0, %v3783_v1, 0.0 }
 0x1c9   : > { %v943_v60 = vadd.f32 %v942_v55, %v941_v21  ;;  %v804_v22 = vpop.permute.xlu1 %803  ;;  %v1189_v5 = vadd.f32 %v1188_v0, %v1187_v58 }
 0x1ca   : > { %v901_v39 = vmul.f32 %v2813_v61, %v804_v22  ;;  %v946_v40 = vsel %vm918_vm3, %v900_v25, 0.0 }
 0x1cb   : > { %v945_v63 = vadd.f32 %v944_v38, %v943_v60  ;;  %v809_v23 = vpop.permute.xlu0 %808 }
 0x1cc   : > { %v902_v46 = vmul.f32 %v809_v23, %v2845_v28  ;;  %v948_v51 = vsel %vm918_vm3, %v901_v39, 0.0  ;;  %v1190_v28 = vsel %vm238_vm0, %v3099_v7, 0.0 }
 0x1cd   : > { %v947_v2 = vadd.f32 %v946_v40, %v945_v63  ;;  %v814_v33 = vpop.permute.xlu1 %813  ;;  %v1191_v8 = vadd.f32 %v1190_v28, %v1189_v5 }
 0x1ce   : > { %v903_v26 = vmul.f32 %v2833_v11, %v814_v33  ;;  %v950_v6 = vsel %vm918_vm3, %v902_v46, 0.0 }
 0x1cf   : > { %v949_v34 = vadd.f32 %v948_v51, %v947_v2  ;;  %v819_v61 = vpop.permute.xlu0 %818 }
 0x1d0   : > { %v904_v9 = vmul.f32 %v819_v61, %v2865_v16  ;;  %v952_v13 = vsel %vm918_vm3, %v903_v26, 0.0  ;;  %v3108_v16 = vld [vmem:[%s2629_s28 + $0xb8] sm:$0xff] }
 0x1d1   : > { %v951_v49 = vadd.f32 %v950_v6, %v949_v34  ;;  %v824_v10 = vpop.permute.xlu1 %823  ;;  %v1192_v29 = vsel %vm238_vm0, %v3108_v16, 0.0 }
 0x1d2   : > { %v905_v14 = vmul.f32 %v2855_v3, %v824_v10  ;;  %v954_v42 = vsel %vm918_vm3, %v904_v9, 0.0  ;;  %v1193_v32 = vadd.f32 %v1192_v29, %v1191_v8 }
 0x1d3   : > { %v953_v11 = vadd.f32 %v952_v13, %v951_v49  ;;  %v829_v54 = vpop.permute.xlu0 %828 }
 0x1d4   : > { %v906_v30 = vmul.f32 %v829_v54, %v2883_v35  ;;  %v956_v52 = vsel %vm918_vm3, %v905_v14, 0.0  ;;  %v3117_v35 = vld [vmem:[%s2629_s28 + $0xc0] sm:$0xff] }
 0x1d5   : > { %v955_v45 = vadd.f32 %v954_v42, %v953_v11  ;;  %v834_v41 = vpop.permute.xlu1 %833  ;;  %v1194_v18 = vsel %vm238_vm0, %v3117_v35, 0.0 }
 0x1d6   : > { %v907_v17 = vmul.f32 %v2873_v31, %v834_v41  ;;  %v958_v57 = vsel %vm918_vm3, %v906_v30, 0.0  ;;  %v1195_v25 = vadd.f32 %v1194_v18, %v1193_v32 }
 0x1d7   : > { %v957_v3 = vadd.f32 %v956_v52, %v955_v45  ;;  %v839_v15 = vpop.permute.xlu0 %838 }
 0x1d8   : > { %v908_v27 = vmul.f32 %v839_v15, %v2785_v47  ;;  %v960_v24 = vsel %vm918_vm3, %v907_v17, 0.0  ;;  %v3126_v47 = vld [vmem:[%s2629_s28 + $0xc8] sm:$0xff] }
 0x1d9   : > { %v959_v43 = vadd.f32 %v958_v57, %v957_v3  ;;  %v844_v21 = vpop.permute.xlu1 %843  ;;  %v1196_v60 = vsel %vm238_vm0, %v3126_v47, 0.0  ;;  %v3161_v17 = vld [vmem:[%s2629_s28 + $0xe8] sm:$0xff] }
 0x1da   : > { %v909_v19 = vmul.f32 %v2779_v44, %v844_v21  ;;  %v962_v36 = vsel %vm918_vm3, %v908_v27, 0.0  ;;  %v1197_v58 = vadd.f32 %v1196_v60, %v1195_v25  ;;  %v3167_v27 = vld [vmem:[%s2629_s28 + $0xf0] sm:$0xff] }
 0x1db   : > { %v961_v31 = vadd.f32 %v960_v24, %v959_v43  ;;  %v849_v55 = vpop.permute.xlu0 %848  ;;  %v1206_v18 = vsel %vm238_vm0, %v3167_v27, 0.0  ;;  %v3172_v24 = vld [vmem:[%s2629_s28 + $0xf8] sm:$0xff] }
 0x1dc   : > { %v910_v48 = vmul.f32 %v849_v55, %v2797_v53  ;;  %v964_v39 = vsel %vm918_vm3, %v909_v19, 0.0  ;;  %v3135_v53 = vld [vmem:[%s2629_s28 + $0xd0] sm:$0xff]  ;;  %v1208_v19 = vsel %vm238_vm0, %v3172_v24, 0.0 }
 0x1dd   : > { %v963_v22 = vadd.f32 %v962_v36, %v961_v31  ;;  %v854_v38 = vpop.permute.xlu1 %853  ;;  %v1198_v1 = vsel %vm238_vm0, %v3135_v53, 0.0 }
 0x1de   : > { %v911_v63 = vmul.f32 %v2791_v50, %v854_v38  ;;  %v966_v40 = vsel %vm918_vm3, %v910_v48, 0.0  ;;  %v1199_v34 = vadd.f32 %v1198_v1, %v1197_v58  ;;  %v1224_v58 = vld [vmem:[%s3743_s3 + $0x30] sm:$0xff] }
 0x1df   : > { %v965_v44 = vadd.f32 %v964_v39, %v963_v22  ;;  %v859_v23 = vpop.permute.xlu0 %858 }
 0x1e0   : > { %v912_v46 = vmul.f32 %v859_v23, %v2809_v59  ;;  %v968_v33 = vsel %vm918_vm3, %v911_v63, 0.0  ;;  %v3144_v59 = vld [vmem:[%s2629_s28 + $0xd8] sm:$0xff] }
 0x1e1   : > { %v967_v0 = vadd.f32 %v966_v40, %v965_v44  ;;  %v864_v2 = vpop.permute.xlu1 %863  ;;  %v1200_v6 = vsel %vm238_vm0, %v3144_v59, 0.0  ;;  %v1225_v44 = vld [vmem:[%s3743_s3 + $0x38] sm:$0xff]  ;;  %v1223_v40 = vld [vmem:[%s3743_s3 + $0x28] sm:$0xff] }
 0x1e2   : > { %v913_v51 = vmul.f32 %v2803_v56, %v864_v2  ;;  %v970_v61 = vsel %vm918_vm3, %v912_v46, 0.0  ;;  %v1201_v14 = vadd.f32 %v1200_v6, %v1199_v34  ;;  %v1222_v46 = vld [vmem:[%s3743_s3 + $0x20] sm:$0xff]  ;;  %v1220_v2 = vld [vmem:[%s3743_s3 + $0x10] sm:$0xff]  ;;  %v1299_v6 = vlaneseq }
 0x1e3   : > { %v969_v50 = vadd.f32 %v968_v33, %v967_v0  ;;  %v869_v26 = vpop.permute.xlu0 %868  ;;  %v1221_v0 = vld [vmem:[%s3743_s3 + $0x18] sm:$0xff] }
 0x1e4   : > { %v914_v5 = vmul.f32 %v869_v26, %v2835_v12  ;;  %v972_v49 = vsel %vm918_vm3, %v913_v51, 0.0  ;;  %v3153_v12 = vld [vmem:[%s2629_s28 + $0xe0] sm:$0xff]  ;;  %v1219_v51 = vld [vmem:[%s3743_s3 + $0x8] sm:$0xff] }
 0x1e5   : > { %v971_v9 = vadd.f32 %v970_v61, %v969_v50  ;;  %v874_v28 = vpop.permute.xlu1 %873  ;;  %v1202_v8 = vsel %vm238_vm0, %v3153_v12, 0.0  ;;  %v1218_v50 = vld [vmem:[%s3743_s3] sm:$0xff] }
 0x1e6   : > { %v915_v56 = vmul.f32 %v2815_v62, %v874_v28  ;;  %v974_v11 = vsel %vm918_vm3, %v914_v5, 0.0  ;;  %v1203_v41 = vadd.f32 %v1202_v8, %v1201_v14  ;;  %v2512_v14 = vld [vmem:[%s2629_s28 + $0x8] sm:$0xff] }
 0x1e7   : > { %v973_v10 = vadd.f32 %v972_v49, %v971_v9  ;;  %v879_v13 = vpop.permute.xlu0 %878  ;;  %v1300_v9 = vshrl.u32 %v1299_v6, 7  ;;  %v2527_v6 = vld [vmem:[%s2629_s28 + $0x78] sm:$0xff] }
 0x1e8   : > { %v916_v54 = vmul.f32 %v879_v13, %v2875_v37  ;;  %v976_v29 = vsel %vm918_vm3, %v915_v56, 0.0  ;;  %v1204_v37 = vsel %vm238_vm0, %v3161_v17, 0.0 }
 0x1e9   : > { %v975_v42 = vadd.f32 %v974_v11, %v973_v10  ;;  %v884_v30 = vpop.permute.xlu1 %883  ;;  %v1205_v57 = vadd.f32 %v1204_v37, %v1203_v41  ;;  %v1301_v28 = vsub.s32 0, %v1300_v9 }
 0x1ea   : > { %v917_v62 = vmul.f32 %v2857_v4, %v884_v30  ;;  %v978_v52 = vsel %vm918_vm3, %v916_v54, 0.0  ;;  %v3216_v54 = vld [vmem:[%s2629_s28] sm:$0xff] }
 0x1eb   : > { %v977_v45 = vadd.f32 %v976_v29, %v975_v42  ;;  %v1207_v43 = vadd.f32 %v1206_v18, %v1205_v57  ;;  %v2514_v29 = vld [vmem:[%s2629_s28 + $0x10] sm:$0xff] }
 0x1ec   : > { %v980_v15 = vsel %vm918_vm3, %v917_v62, 0.0  ;;  %v2518_v18 = vld [vmem:[%s2629_s28 + $0x30] sm:$0xff] }
 0x1ed   : > { %v979_v3 = vadd.f32 %v978_v52, %v977_v45  ;;  %v1209_v31 = vadd.f32 %v1208_v19, %v1207_v43  ;;  %v2515_v45 = vld [vmem:[%s2629_s28 + $0x18] sm:$0xff] }
 0x1ee   : > { %v2519_v19 = vld [vmem:[%s2629_s28 + $0x38] sm:$0xff] }
 0x1ef   : > { %v981_v32 = vadd.f32 %v980_v15, %v979_v3  ;;  %v1210_v25 = vrot.slane %v1209_v31, 4  ;;  %v2516_v3 = vld [vmem:[%s2629_s28 + $0x20] sm:$0xff] }
 0x1f1   : > { %v982_v4 = vrot.slane %v981_v32, 4  ;;  %v1211_v48 = vadd.f32 %v1210_v25, %v1209_v31 }
 0x1f3   : > { %v983_v21 = vadd.f32 %v982_v4, %v981_v32  ;;  %v1212_v22 = vrot.slane %v1211_v48, 2  ;;  %v2517_v32 = vld [vmem:[%s2629_s28 + $0x28] sm:$0xff] }
 0x1f5   : > { %v984_v55 = vrot.slane %v983_v21, 2  ;;  %v1213_v23 = vadd.f32 %v1212_v22, %v1211_v48 }
 0x1f7   : > { %v985_v36 = vadd.f32 %v984_v55, %v983_v21  ;;  %v1214_v1 = vrot.slane %v1213_v23, 1 }
 0x1f9   : > { %v986_v60 = vrot.slane %v985_v36, 1  ;;  %v1215_v33 = vadd.f32 %v1214_v1, %v1213_v23  ;;  %v2522_v23 = vld [vmem:[%s2629_s28 + $0x50] sm:$0xff] }
 0x1fb   : > { %v987_v38 = vadd.f32 %v986_v60, %v985_v36  ;;  %v1217_v26 = vmul.f32 0.00390625, %v1215_v33  ;;  %v2520_v60 = vld [vmem:[%s2629_s28 + $0x40] sm:$0xff] }
 0x205   : > { %v1061_v39 = vpop.permute.xlu0 %1060 }
 0x206   : > { %v1063_v63 = vmul.f32 %v1061_v39, %v987_v38  ;;  %v2521_v38 = vld [vmem:[%s2629_s28 + $0x48] sm:$0xff] }
 0x208   : > { %2188 = vmatmul.mubr.msk.f32.vlgmr.msra.gmra.mxu1 %vm918_vm3, %v1063_v63 }
 0x209   : > { %2191 = vmatpush3.msra.mxu1 %v1225_v44  ;;  %2206 = vmatprep.mubr.msk.f32.mxu1 %vm2575_vm2, %v2574_v20 }
 0x20a   : > { %2192 = vmatprep.subr.mxu1 %v2574_v20 }
 0x20b   : > { %2193 = vmatpush3.msra.mxu1 %v1224_v58 }
 0x20c   : > { %2194 = vmatprep.subr.mxu1 %v2574_v20 }
 0x20d   : > { %2195 = vmatpush3.msra.mxu1 %v1223_v40  ;;  %v2523_v40 = vld [vmem:[%s2629_s28 + $0x58] sm:$0xff] }
 0x20e   : > { %2196 = vmatprep.subr.mxu1 %v2574_v20 }
 0x20f   : > { %2197 = vmatpush3.msra.mxu1 %v1222_v46 }
 0x210   : > { %2198 = vmatprep.subr.mxu1 %v2574_v20 }
 0x211   : > { %2199 = vmatpush3.msra.mxu1 %v1221_v0 }
 0x212   : > { %2200 = vmatprep.subr.mxu1 %v2574_v20 }
 0x213   : > { %2201 = vmatpush3.msra.mxu1 %v1220_v2  ;;  %v2524_v2 = vld [vmem:[%s2629_s28 + $0x60] sm:$0xff] }
 0x214   : > { %2202 = vmatprep.subr.mxu1 %v2574_v20 }
 0x215   : > { %2203 = vmatpush3.msra.mxu1 %v1219_v51  ;;  %v2525_v51 = vld [vmem:[%s2629_s28 + $0x68] sm:$0xff] }
 0x216   : > { %2204 = vmatprep.subr.mxu1 %v2574_v20 }
 0x217   : > { %2205 = vmatpush3.msra.mxu1 %v1218_v50 }
 0x218   : > { %2207 = vmatmul.mubr.msk.f32.vlgmr.msra.gmra.mxu1 %vm238_vm0, %v1217_v26 }
 0x2c8   : > { %v1137_v34 = vpop.f32.mrf.mxu1 }
 0x2c9   : > { %v2023_v61 = vmul.f32 -1.442695, %v1137_v34 }
 0x2ca   : > { %v2189_v5 = vpop.f32.mrf.mxu1 }
 0x2cb   : > { %2304 = vpow2.f32 %v2023_v61  ;;  %v2526_v61 = vld [vmem:[%s2629_s28 + $0x70] sm:$0xff] }
 0x2d8   : > { %v2305_v49 = vpop.eup %2304  ;;  %v1295_v56 = vpop.f32.mrf.mxu1 }
 0x2d9   : > { %v1144_v10 = vadd.f32 1.0, %v2305_v49  ;;  %v3211_v13 = vrot.slane %v1295_v56, %v1301_v28  ;;  %v2528_v56 = vld [vmem:[%s2629_s28 + $0x80] sm:$0xff] }
 0x2da   : > { %v2208_v20 = vpop.f32.mrf.mxu1 }
 0x2db   : > { %2306 = vrcp.f32 %v1144_v10  ;;  %v1304_v11 = vmul.f32 %v2512_v14, %v3211_v13  ;;  %v1303_v8 = vmul.f32 %v3216_v54, %v3211_v13  ;;  %v1305_v62 = vmul.f32 %v2514_v29, %v3211_v13  ;;  %v2529_v20 = vld [vmem:[%s2629_s28 + $0x88] sm:$0xff]  ;;  %v2531_v29 = vld [vmem:[%s2629_s28 + $0x98] sm:$0xff] }
 0x2dc   : > { %v1306_v41 = vmul.f32 %v2515_v45, %v3211_v13  ;;  %v1307_v15 = vmul.f32 %v2516_v3, %v3211_v13  ;;  %v1308_v57 = vmul.f32 %v2517_v32, %v3211_v13  ;;  %v1309_v4 = vmul.f32 %v2518_v18, %v3211_v13  ;;  %v2533_v3 = vld [vmem:[%s2629_s28 + $0xa8] sm:$0xff] }
 0x2dd   : > { %v1338_v42 = vsel %vm238_vm0, %v1304_v11, 0.0  ;;  %v1335_v30 = vsel %vm238_vm0, %v1303_v8, 0.0  ;;  %v1341_v52 = vsel %vm238_vm0, %v1305_v62, 0.0  ;;  %v1310_v31 = vmul.f32 %v2519_v19, %v3211_v13 }
 0x2de   : > { %1339 = vadd.xlane.f32.xlu0 %v1338_v42  ;;  %1336 = vadd.xlane.f32.xlu1 %v1335_v30  ;;  %v1344_v37 = vsel %vm238_vm0, %v1306_v41, 0.0  ;;  %v1347_v43 = vsel %vm238_vm0, %v1307_v15, 0.0  ;;  %v1350_v21 = vsel %vm238_vm0, %v1308_v57, 0.0  ;;  %v1353_v25 = vsel %vm238_vm0, %v1309_v4, 0.0  ;;  %v2530_v42 = vld [vmem:[%s2629_s28 + $0x90] sm:$0xff] }
 0x2df   : > { %v1356_v48 = vsel %vm238_vm0, %v1310_v31, 0.0  ;;  %v1311_v22 = vmul.f32 %v2520_v60, %v3211_v13  ;;  %v1312_v39 = vmul.f32 %v2521_v38, %v3211_v13  ;;  %v1313_v58 = vmul.f32 %v2522_v23, %v3211_v13 }
 0x2e0   : > { %v1314_v46 = vmul.f32 %v2523_v40, %v3211_v13  ;;  %v1315_v33 = vmul.f32 %v2524_v2, %v3211_v13  ;;  %v1316_v50 = vmul.f32 %v2525_v51, %v3211_v13  ;;  %v1317_v5 = vmul.f32 %v2526_v61, %v3211_v13 }
 0x2e1   : > { %v1359_v63 = vsel %vm238_vm0, %v1311_v22, 0.0  ;;  %v1362_v44 = vsel %vm238_vm0, %v1312_v39, 0.0  ;;  %v1365_v1 = vsel %vm238_vm0, %v1313_v58, 0.0  ;;  %v1318_v9 = vmul.f32 %v2527_v6, %v3211_v13 }
 0x2e2   : > { %1342 = vadd.xlane.f32.xlu0 %v1341_v52  ;;  %1345 = vadd.xlane.f32.xlu1 %v1344_v37  ;;  %v1368_v0 = vsel %vm238_vm0, %v1314_v46, 0.0  ;;  %v1371_v26 = vsel %vm238_vm0, %v1315_v33, 0.0  ;;  %v1374_v34 = vsel %vm238_vm0, %v1316_v50, 0.0  ;;  %v1319_v10 = vmul.f32 %v2528_v56, %v3211_v13  ;;  %v2532_v52 = vld [vmem:[%s2629_s28 + $0xa0] sm:$0xff] }
 0x2e3   : > { %v1380_v49 = vsel %vm238_vm0, %v1318_v9, 0.0  ;;  %v1320_v14 = vmul.f32 %v2529_v20, %v3211_v13  ;;  %v1321_v30 = vmul.f32 %v2530_v42, %v3211_v13  ;;  %v1322_v62 = vmul.f32 %v2531_v29, %v3211_v13 }
 0x2e4   : > { %v1383_v11 = vsel %vm238_vm0, %v1319_v10, 0.0  ;;  %v1323_v37 = vmul.f32 %v2532_v52, %v3211_v13  ;;  %v1324_v15 = vmul.f32 %v2533_v3, %v3211_v13  ;;  %v1325_v18 = vmul.f32 %v3099_v7, %v3211_v13 }
 0x2e5   : > { %v1386_v8 = vsel %vm238_vm0, %v1320_v14, 0.0  ;;  %v1389_v45 = vsel %vm238_vm0, %v1321_v30, 0.0  ;;  %v1392_v41 = vsel %vm238_vm0, %v1322_v62, 0.0  ;;  %v1326_v4 = vmul.f32 %v3108_v16, %v3211_v13 }
 0x2e6   : > { %1348 = vadd.xlane.f32.xlu0 %v1347_v43  ;;  %1351 = vadd.xlane.f32.xlu1 %v1350_v21  ;;  %v1395_v32 = vsel %vm238_vm0, %v1323_v37, 0.0  ;;  %v1398_v57 = vsel %vm238_vm0, %v1324_v15, 0.0  ;;  %v1401_v43 = vsel %vm238_vm0, %v1325_v18, 0.0  ;;  %v1327_v19 = vmul.f32 %v3117_v35, %v3211_v13 }
 0x2e7   : > { %v1404_v21 = vsel %vm238_vm0, %v1326_v4, 0.0  ;;  %v1328_v31 = vmul.f32 %v3126_v47, %v3211_v13  ;;  %v1329_v16 = vmul.f32 %v3135_v53, %v3211_v13  ;;  %v1331_v47 = vmul.f32 %v3153_v12, %v3211_v13 }
 0x2e8   : > { %v2307_v55 = vpop.eup %2306  ;;  %v1332_v60 = vmul.f32 %v3161_v17, %v3211_v13  ;;  %v1334_v38 = vmul.f32 %v3172_v24, %v3211_v13 }
 0x2e9   : > { %v3239_v36 = vrot.slane %v2307_v55, %v1301_v28  ;;  %v1377_v28 = vsel %vm238_vm0, %v1317_v5, 0.0  ;;  %v1407_v55 = vsel %vm238_vm0, %v1327_v19, 0.0  ;;  %v1410_v7 = vsel %vm238_vm0, %v1328_v31, 0.0 }
 0x2ea   : > { %1354 = vadd.xlane.f32.xlu0 %v1353_v25  ;;  %1357 = vadd.xlane.f32.xlu1 %v1356_v48  ;;  %v1330_v25 = vmul.f32 %v3144_v59, %v3211_v13  ;;  %v1413_v48 = vsel %vm238_vm0, %v1329_v16, 0.0  ;;  %v1419_v22 = vsel %vm238_vm0, %v1331_v47, 0.0  ;;  %v1422_v53 = vsel %vm238_vm0, %v1332_v60, 0.0 }
 0x2eb   : > { %v1333_v59 = vmul.f32 %v3167_v27, %v3211_v13  ;;  %v1428_v12 = vsel %vm238_vm0, %v1334_v38, 0.0 }
 0x2ec   : > { %v1416_v35 = vsel %vm238_vm0, %v1330_v25, 0.0 }
 0x2ed   : > { %v1425_v39 = vsel %vm238_vm0, %v1333_v59, 0.0 }
 0x2ee   : > { %1360 = vadd.xlane.f32.xlu0 %v1359_v63  ;;  %1363 = vadd.xlane.f32.xlu1 %v1362_v44 }
 0x2f2   : > { %1366 = vadd.xlane.f32.xlu0 %v1365_v1  ;;  %1369 = vadd.xlane.f32.xlu1 %v1368_v0 }
 0x2f6   : > { %1372 = vadd.xlane.f32.xlu0 %v1371_v26  ;;  %1375 = vadd.xlane.f32.xlu1 %v1374_v34 }
 0x2fa   : > { %1378 = vadd.xlane.f32.xlu0 %v1377_v28  ;;  %1381 = vadd.xlane.f32.xlu1 %v1380_v49 }
 0x2fe   : > { %1384 = vadd.xlane.f32.xlu0 %v1383_v11  ;;  %1387 = vadd.xlane.f32.xlu1 %v1386_v8 }
 0x302   : > { %1390 = vadd.xlane.f32.xlu0 %v1389_v45  ;;  %1393 = vadd.xlane.f32.xlu1 %v1392_v41 }
 0x306   : > { %1396 = vadd.xlane.f32.xlu0 %v1395_v32  ;;  %1399 = vadd.xlane.f32.xlu1 %v1398_v57 }
 0x30a   : > { %1402 = vadd.xlane.f32.xlu0 %v1401_v43  ;;  %1405 = vadd.xlane.f32.xlu1 %v1404_v21 }
 0x30e   : > { %1408 = vadd.xlane.f32.xlu0 %v1407_v55  ;;  %1411 = vadd.xlane.f32.xlu1 %v1410_v7 }
 0x312   : > { %1414 = vadd.xlane.f32.xlu0 %v1413_v48  ;;  %1417 = vadd.xlane.f32.xlu1 %v1416_v35 }
 0x316   : > { %1420 = vadd.xlane.f32.xlu0 %v1419_v22  ;;  %1423 = vadd.xlane.f32.xlu1 %v1422_v53 }
 0x31a   : > { %1426 = vadd.xlane.f32.xlu0 %v1425_v39  ;;  %1429 = vadd.xlane.f32.xlu1 %v1428_v12 }
 0x367   : > { %v3314_v17 = vpop.xlane.xlu0 %1339  ;;  %v3316_v63 = vpop.xlane.xlu1 %1336 }
 0x36b   : > { %v3318_v44 = vpop.xlane.xlu0 %1342  ;;  %v3320_v23 = vpop.xlane.xlu1 %1345 }
 0x36f   : > { %v3322_v27 = vpop.xlane.xlu0 %1348  ;;  %v3324_v58 = vpop.xlane.xlu1 %1351 }
 0x370   : > { %v1431_v56 = vmax.f32 %v3316_v63, %v3322_v27  ;;  %v1432_v10 = vmax.f32 %v3314_v17, %v3324_v58 }
 0x373   : > { %v3326_v24 = vpop.xlane.xlu0 %1354  ;;  %v3328_v13 = vpop.xlane.xlu1 %1357 }
 0x374   : > { %v1433_v11 = vmax.f32 %v3318_v44, %v3326_v24  ;;  %v1434_v8 = vmax.f32 %v3320_v23, %v3328_v13 }
 0x377   : > { %v3330_v40 = vpop.xlane.xlu0 %1360  ;;  %v3332_v46 = vpop.xlane.xlu1 %1363 }
 0x378   : > { %v1435_v42 = vmax.f32 %v1431_v56, %v3330_v40  ;;  %v1436_v30 = vmax.f32 %v1432_v10, %v3332_v46 }
 0x37b   : > { %v3334_v1 = vpop.xlane.xlu0 %1366  ;;  %v3336_v0 = vpop.xlane.xlu1 %1369 }
 0x37c   : > { %v1437_v29 = vmax.f32 %v1433_v11, %v3334_v1  ;;  %v1438_v62 = vmax.f32 %v1434_v8, %v3336_v0 }
 0x37f   : > { %v3338_v2 = vpop.xlane.xlu0 %1372  ;;  %v3340_v33 = vpop.xlane.xlu1 %1375 }
 0x380   : > { %v1439_v45 = vmax.f32 %v1435_v42, %v3338_v2  ;;  %v1440_v41 = vmax.f32 %v1436_v30, %v3340_v33 }
 0x383   : > { %v3342_v51 = vpop.xlane.xlu0 %1378  ;;  %v3344_v50 = vpop.xlane.xlu1 %1381 }
 0x384   : > { %v1441_v3 = vmax.f32 %v1437_v29, %v3342_v51  ;;  %v1442_v15 = vmax.f32 %v1438_v62, %v3344_v50 }
 0x387   : > { %v3346_v26 = vpop.xlane.xlu0 %1384  ;;  %v3348_v34 = vpop.xlane.xlu1 %1387 }
 0x388   : > { %v1443_v32 = vmax.f32 %v1439_v45, %v3346_v26  ;;  %v1444_v57 = vmax.f32 %v1440_v41, %v3348_v34 }
 0x38b   : > { %v3350_v61 = vpop.xlane.xlu0 %1390  ;;  %v3352_v5 = vpop.xlane.xlu1 %1393 }
 0x38c   : > { %v1445_v18 = vmax.f32 %v1441_v3, %v3350_v61  ;;  %v1446_v4 = vmax.f32 %v1442_v15, %v3352_v5 }
 0x38f   : > { %v3354_v6 = vpop.xlane.xlu0 %1396  ;;  %v3356_v9 = vpop.xlane.xlu1 %1399 }
 0x390   : > { %v1447_v43 = vmax.f32 %v1443_v32, %v3354_v6  ;;  %v1448_v21 = vmax.f32 %v1444_v57, %v3356_v9 }
 0x393   : > { %v3358_v28 = vpop.xlane.xlu0 %1402  ;;  %v3360_v49 = vpop.xlane.xlu1 %1405 }
 0x394   : > { %v1449_v55 = vmax.f32 %v1445_v18, %v3358_v28  ;;  %v1450_v7 = vmax.f32 %v1446_v4, %v3360_v49 }
 0x397   : > { %v3366_v20 = vpop.xlane.xlu0 %1408  ;;  %v3368_v14 = vpop.xlane.xlu1 %1411 }
 0x398   : > { %v1451_v16 = vmax.f32 %v1447_v43, %v3366_v20  ;;  %v1452_v25 = vmax.f32 %v1448_v21, %v3368_v14 }
 0x39b   : > { %v3380_v52 = vpop.xlane.xlu0 %1414  ;;  %v3382_v37 = vpop.xlane.xlu1 %1417 }
 0x39c   : > { %v1453_v48 = vmax.f32 %v1449_v55, %v3380_v52  ;;  %v1454_v35 = vmax.f32 %v1450_v7, %v3382_v37 }
 0x39f   : > { %v3392_v19 = vpop.xlane.xlu0 %1420  ;;  %v3394_v31 = vpop.xlane.xlu1 %1423 }
 0x3a0   : > { %v1455_v47 = vmax.f32 %v1451_v16, %v3392_v19  ;;  %v1456_v60 = vmax.f32 %v1452_v25, %v3394_v31 }
 0x3a2   : > { %v1459_v39 = vmax.f32 %v1455_v47, %v1456_v60 }
 0x3a3   : > { %v3404_v22 = vpop.xlane.xlu0 %1426  ;;  %v3406_v53 = vpop.xlane.xlu1 %1429 }
 0x3a4   : > { %v1457_v59 = vmax.f32 %v1453_v48, %v3404_v22  ;;  %v1458_v38 = vmax.f32 %v1454_v35, %v3406_v53 }
 0x3a6   : > { %v1460_v12 = vmax.f32 %v1457_v59, %v1458_v38 }
 0x3a8   : > { %v1461_v56 = vmax.f32 %v1459_v39, %v1460_v12 }
 0x3aa   : > { %v1462_v10 = vrot.slane %v1461_v56, 4 }
 0x3ac   : > { %v1463_v11 = vmax.f32 %v1461_v56, %v1462_v10 }
 0x3ae   : > { %v1464_v8 = vrot.slane %v1463_v11, 2 }
 0x3b0   : > { %v1465_v42 = vmax.f32 %v1463_v11, %v1464_v8 }
 0x3b2   : > { %v1466_v30 = vrot.slane %v1465_v42, 1 }
 0x3b4   : > { %v3410_v29 = vmax.f32 %v1465_v42, %v1466_v30 }
 0x3b6   : > { %v1468_v62 = vsub.f32 %v3316_v63, %v3410_v29  ;;  %v1469_v45 = vsub.f32 %v3314_v17, %v3410_v29  ;;  %v1470_v41 = vsub.f32 %v3318_v44, %v3410_v29  ;;  %v1471_v3 = vsub.f32 %v3320_v23, %v3410_v29 }
 0x3b7   : > { %v1472_v57 = vsub.f32 %v3322_v27, %v3410_v29  ;;  %v1473_v4 = vsub.f32 %v3324_v58, %v3410_v29  ;;  %v1474_v17 = vsub.f32 %v3326_v24, %v3410_v29  ;;  %v1475_v23 = vsub.f32 %v3328_v13, %v3410_v29 }
 0x3b8   : > { %v1500_v15 = vmul.f32 1.442695, %v1468_v62  ;;  %v1502_v32 = vmul.f32 1.442695, %v1469_v45  ;;  %v1504_v18 = vmul.f32 1.442695, %v1470_v41  ;;  %v1476_v27 = vsub.f32 %v3330_v40, %v3410_v29 }
 0x3b9   : > { %v1506_v63 = vmul.f32 1.442695, %v1471_v3  ;;  %v1508_v44 = vmul.f32 1.442695, %v1472_v57  ;;  %v1510_v43 = vmul.f32 1.442695, %v1473_v4  ;;  %v1477_v58 = vsub.f32 %v3332_v46, %v3410_v29 }
 0x3ba   : > { %2308 = vpow2.f32 %v1500_v15  ;;  %v1512_v21 = vmul.f32 1.442695, %v1474_v17  ;;  %v1514_v55 = vmul.f32 1.442695, %v1475_v23  ;;  %v1478_v24 = vsub.f32 %v3334_v1, %v3410_v29 }
 0x3bb   : > { %2310 = vpow2.f32 %v1502_v32  ;;  %v1516_v7 = vmul.f32 1.442695, %v1476_v27  ;;  %v1479_v13 = vsub.f32 %v3336_v0, %v3410_v29  ;;  %v1518_v25 = vmul.f32 1.442695, %v1477_v58 }
 0x3bc   : > { %2312 = vpow2.f32 %v1504_v18  ;;  %v1480_v48 = vsub.f32 %v3338_v2, %v3410_v29  ;;  %v1520_v46 = vmul.f32 1.442695, %v1478_v24  ;;  %v1481_v47 = vsub.f32 %v3340_v33, %v3410_v29 }
 0x3bd   : > { %2314 = vpow2.f32 %v1506_v63  ;;  %v1522_v60 = vmul.f32 1.442695, %v1479_v13  ;;  %v1482_v38 = vsub.f32 %v3342_v51, %v3410_v29  ;;  %v1483_v56 = vsub.f32 %v3344_v50, %v3410_v29 }
 0x3be   : > { %2316 = vpow2.f32 %v1508_v44  ;;  %v1524_v2 = vmul.f32 1.442695, %v1480_v48  ;;  %v1526_v33 = vmul.f32 1.442695, %v1481_v47  ;;  %v1484_v8 = vsub.f32 %v3346_v26, %v3410_v29 }
 0x3bf   : > { %2318 = vpow2.f32 %v1510_v43  ;;  %v1528_v51 = vmul.f32 1.442695, %v1482_v38  ;;  %v1485_v62 = vsub.f32 %v3348_v34, %v3410_v29  ;;  %v1530_v50 = vmul.f32 1.442695, %v1483_v56 }
 0x3c0   : > { %2320 = vpow2.f32 %v1512_v21  ;;  %v1486_v3 = vsub.f32 %v3350_v61, %v3410_v29  ;;  %v1532_v26 = vmul.f32 1.442695, %v1484_v8  ;;  %v1487_v57 = vsub.f32 %v3352_v5, %v3410_v29 }
 0x3c1   : > { %2322 = vpow2.f32 %v1514_v55  ;;  %v1534_v34 = vmul.f32 1.442695, %v1485_v62  ;;  %v1488_v63 = vsub.f32 %v3354_v6, %v3410_v29  ;;  %v1489_v23 = vsub.f32 %v3356_v9, %v3410_v29 }
 0x3c2   : > { %2324 = vpow2.f32 %v1516_v7  ;;  %v1536_v61 = vmul.f32 1.442695, %v1486_v3  ;;  %v1538_v5 = vmul.f32 1.442695, %v1487_v57  ;;  %v1490_v21 = vsub.f32 %v3358_v28, %v3410_v29 }
 0x3c3   : > { %2326 = vpow2.f32 %v1518_v25  ;;  %v1540_v6 = vmul.f32 1.442695, %v1488_v63  ;;  %v1491_v24 = vsub.f32 %v3360_v49, %v3410_v29  ;;  %v1542_v9 = vmul.f32 1.442695, %v1489_v23 }
 0x3c4   : > { %2328 = vpow2.f32 %v1520_v46  ;;  %v1492_v25 = vsub.f32 %v3366_v20, %v3410_v29  ;;  %v1544_v28 = vmul.f32 1.442695, %v1490_v21 }
 0x3c5   : > { %2330 = vpow2.f32 %v1522_v60  ;;  %v1546_v49 = vmul.f32 1.442695, %v1491_v24 }
 0x3c6   : > { %2332 = vpow2.f32 %v1524_v2  ;;  %v1548_v20 = vmul.f32 1.442695, %v1492_v25 }
 0x3c7   : > { %v3434_v16 = vpop.eup %2308  ;;  %2334 = vpow2.f32 %v1526_v33 }
 0x3c8   : > { %v3438_v40 = vpop.eup %2310  ;;  %2336 = vpow2.f32 %v1528_v51 }
 0x3c9   : > { %v1564_v35 = vadd.f32 %v3438_v40, %v3434_v16  ;;  %v3444_v1 = vpop.eup %2312  ;;  %2338 = vpow2.f32 %v1530_v50 }
 0x3ca   : > { %v3449_v59 = vpop.eup %2314  ;;  %2340 = vpow2.f32 %v1532_v26 }
 0x3cb   : > { %v1565_v0 = vadd.f32 %v3444_v1, %v1564_v35  ;;  %v3454_v12 = vpop.eup %2316  ;;  %2342 = vpow2.f32 %v1534_v34  ;;  %v1493_v35 = vsub.f32 %v3368_v14, %v3410_v29 }
 0x3cc   : > { %v3459_v11 = vpop.eup %2318  ;;  %2344 = vpow2.f32 %v1536_v61 }
 0x3cd   : > { %v1566_v39 = vadd.f32 %v3449_v59, %v1565_v0  ;;  %v3464_v30 = vpop.eup %2320  ;;  %2346 = vpow2.f32 %v1538_v5  ;;  %v1494_v0 = vsub.f32 %v3380_v52, %v3410_v29  ;;  %v1550_v14 = vmul.f32 1.442695, %v1493_v35 }
 0x3ce   : > { %v3469_v41 = vpop.eup %2322  ;;  %2348 = vpow2.f32 %v1540_v6 }
 0x3cf   : > { %v1567_v10 = vadd.f32 %v3454_v12, %v1566_v39  ;;  %v3474_v32 = vpop.eup %2324  ;;  %2350 = vpow2.f32 %v1542_v9  ;;  %v1495_v39 = vsub.f32 %v3382_v37, %v3410_v29  ;;  %v1552_v52 = vmul.f32 1.442695, %v1494_v0 }
 0x3d0   : > { %v3479_v4 = vpop.eup %2326  ;;  %2352 = vpow2.f32 %v1544_v28 }
 0x3d1   : > { %v1568_v42 = vadd.f32 %v3459_v11, %v1567_v10  ;;  %v3484_v44 = vpop.eup %2328  ;;  %2354 = vpow2.f32 %v1546_v49  ;;  %v1496_v10 = vsub.f32 %v3392_v19, %v3410_v29  ;;  %v1554_v62 = vmul.f32 1.442695, %v1495_v39 }
 0x3d2   : > { %v3489_v27 = vpop.eup %2330  ;;  %2356 = vpow2.f32 %v1548_v20  ;;  %v1499_v19 = vsub.f32 %v3406_v53, %v3410_v29 }
 0x3d3   : > { %v1569_v45 = vadd.f32 %v3464_v30, %v1568_v42  ;;  %v3494_v55 = vpop.eup %2332  ;;  %v1497_v42 = vsub.f32 %v3394_v31, %v3410_v29  ;;  %2358 = vpow2.f32 %v1550_v14  ;;  %v1556_v3 = vmul.f32 1.442695, %v1496_v10 }
 0x3d4   : > { %v3499_v13 = vpop.eup %2334  ;;  %2360 = vpow2.f32 %v1552_v52 }
 0x3d5   : > { %v1570_v15 = vadd.f32 %v3469_v41, %v1569_v45  ;;  %v3504_v46 = vpop.eup %2336  ;;  %v1498_v45 = vsub.f32 %v3404_v22, %v3410_v29  ;;  %2362 = vpow2.f32 %v1554_v62  ;;  %v1558_v57 = vmul.f32 1.442695, %v1497_v42 }
 0x3d6   : > { %v3509_v60 = vpop.eup %2338  ;;  %2364 = vpow2.f32 %v1556_v3 }
 0x3d7   : > { %v1571_v18 = vadd.f32 %v3474_v32, %v1570_v15  ;;  %v3514_v2 = vpop.eup %2340  ;;  %v1560_v31 = vmul.f32 1.442695, %v1498_v45  ;;  %2366 = vpow2.f32 %v1558_v57 }
 0x3d8   : > { %v3519_v33 = vpop.eup %2342 }
 0x3d9   : > { %v1572_v17 = vadd.f32 %v3479_v4, %v1571_v18  ;;  %v2345_v51 = vpop.eup %2344  ;;  %2368 = vpow2.f32 %v1560_v31 }
 0x3da   : > { %v2347_v50 = vpop.eup %2346 }
 0x3db   : > { %v1573_v43 = vadd.f32 %v3484_v44, %v1572_v17  ;;  %v2349_v15 = vpop.eup %2348  ;;  %v1562_v17 = vmul.f32 1.442695, %v1499_v19 }
 0x3dc   : > { %v2351_v18 = vpop.eup %2350 }
 0x3dd   : > { %v1574_v58 = vadd.f32 %v3489_v27, %v1573_v43  ;;  %v2353_v61 = vpop.eup %2352  ;;  %2370 = vpow2.f32 %v1562_v17 }
 0x3de   : > { %v2355_v5 = vpop.eup %2354 }
 0x3df   : > { %v1575_v7 = vadd.f32 %v3494_v55, %v1574_v58  ;;  %v2357_v43 = vpop.eup %2356 }
 0x3e0   : > { %v2359_v6 = vpop.eup %2358 }
 0x3e1   : > { %v1576_v48 = vadd.f32 %v3499_v13, %v1575_v7  ;;  %v2361_v53 = vpop.eup %2360 }
 0x3e2   : > { %v2363_v24 = vpop.eup %2362 }
 0x3e3   : > { %v1577_v47 = vadd.f32 %v3504_v46, %v1576_v48  ;;  %v2365_v7 = vpop.eup %2364 }
 0x3e4   : > { %v2367_v28 = vpop.eup %2366 }
 0x3e5   : > { %v1578_v38 = vadd.f32 %v3509_v60, %v1577_v47 }
 0x3e6   : > { %v2369_v35 = vpop.eup %2368 }
 0x3e7   : > { %v1579_v56 = vadd.f32 %v3514_v2, %v1578_v38 }
 0x3e9   : > { %v1580_v8 = vadd.f32 %v3519_v33, %v1579_v56 }
 0x3ea   : > { %v2371_v47 = vpop.eup %2370 }
 0x3eb   : > { %v1581_v37 = vadd.f32 %v2345_v51, %v1580_v8 }
 0x3ed   : > { %v1582_v26 = vadd.f32 %v2347_v50, %v1581_v37 }
 0x3ef   : > { %v1583_v34 = vadd.f32 %v2349_v15, %v1582_v26 }
 0x3f1   : > { %v1584_v63 = vadd.f32 %v2351_v18, %v1583_v34 }
 0x3f3   : > { %v1585_v23 = vadd.f32 %v2353_v61, %v1584_v63 }
 0x3f5   : > { %v1586_v22 = vadd.f32 %v2355_v5, %v1585_v23 }
 0x3f7   : > { %v1587_v21 = vadd.f32 %v2357_v43, %v1586_v22 }
 0x3f9   : > { %v1588_v58 = vadd.f32 %v2359_v6, %v1587_v21 }
 0x3fb   : > { %v1589_v29 = vadd.f32 %v2361_v53, %v1588_v58 }
 0x3fd   : > { %v1590_v9 = vadd.f32 %v2363_v24, %v1589_v29 }
 0x3ff   : > { %v1591_v25 = vadd.f32 %v2365_v7, %v1590_v9 }
 0x401   : > { %v1592_v48 = vadd.f32 %v2367_v28, %v1591_v25 }
 0x403   : > { %v1593_v49 = vadd.f32 %v2369_v35, %v1592_v48 }
 0x405   : > { %v1594_v0 = vadd.f32 %v2371_v47, %v1593_v49 }
 0x407   : > { %v1595_v20 = vrot.slane %v1594_v0, 4 }
 0x409   : > { %v1596_v38 = vadd.f32 %v1595_v20, %v1594_v0 }
 0x40b   : > { %v1597_v39 = vrot.slane %v1596_v38, 2 }
 0x40d   : > { %v1598_v14 = vadd.f32 %v1597_v39, %v1596_v38 }
 0x40f   : > { %v1599_v56 = vrot.slane %v1598_v14, 1 }
 0x411   : > { %v1600_v10 = vadd.f32 %v1599_v56, %v1598_v14 }
 0x413   : > { %2372 = vrcp.f32 %v1600_v10 }
 0x420   : > { %v2373_v52 = vpop.eup %2372 }
 0x421   : > { %v1602_v8 = vmul.f32 %v2373_v52, %v3434_v16  ;;  %v1603_v42 = vmul.f32 %v2373_v52, %v3438_v40  ;;  %v1604_v62 = vmul.f32 %v2373_v52, %v3444_v1  ;;  %v1605_v37 = vmul.f32 %v2373_v52, %v3449_v59 }
 0x422   : > { %v1606_v45 = vmul.f32 %v2373_v52, %v3454_v12  ;;  %v1607_v3 = vmul.f32 %v2373_v52, %v3459_v11  ;;  %v1617_v26 = vmul.f32 %v2373_v52, %v3509_v60  ;;  %v1618_v19 = vmul.f32 %v2373_v52, %v3514_v2 }
 0x423   : > { %v1619_v57 = vmul.f32 %v2373_v52, %v3519_v33  ;;  %v1620_v34 = vmul.f32 %v2373_v52, %v2345_v51  ;;  %v1621_v31 = vmul.f32 %v2373_v52, %v2347_v50  ;;  %v1622_v63 = vmul.f32 %v2373_v52, %v2349_v15 }
 0x424   : > { %v3539_v16 = vmul.f32 %v2373_v52, %v2351_v18  ;;  %v3541_v40 = vmul.f32 %v2373_v52, %v2353_v61  ;;  %v3543_v1 = vmul.f32 %v2373_v52, %v2355_v5  ;;  %v3545_v59 = vmul.f32 %v2373_v52, %v2357_v43 }
 0x425   : > { %v3547_v12 = vmul.f32 %v2373_v52, %v2359_v6  ;;  %v3549_v11 = vmul.f32 %v2373_v52, %v2361_v53  ;;  %v3551_v60 = vmul.f32 %v2373_v52, %v2363_v24  ;;  %v3553_v2 = vmul.f32 %v2373_v52, %v2365_v7 }
 0x426   : > { %v3555_v33 = vmul.f32 %v2373_v52, %v2367_v28  ;;  %v3557_v51 = vmul.f32 %v2373_v52, %v2369_v35  ;;  %v3559_v50 = vmul.f32 %v2373_v52, %v2371_v47  ;;  %v1608_v15 = vmul.f32 %v2373_v52, %v3464_v30 }
 0x427   : > { %v2025_v18 = vmul.f32 -1.442695, %v1602_v8  ;;  %v2026_v61 = vmul.f32 -1.442695, %v1603_v42  ;;  %v2027_v17 = vmul.f32 -1.442695, %v1604_v62  ;;  %v1609_v23 = vmul.f32 %v2373_v52, %v3469_v41 }
 0x428   : > { %v2028_v5 = vmul.f32 -1.442695, %v1605_v37  ;;  %v1610_v22 = vmul.f32 %v2373_v52, %v3474_v32  ;;  %v2029_v43 = vmul.f32 -1.442695, %v1606_v45  ;;  %v1611_v21 = vmul.f32 %v2373_v52, %v3479_v4 }
 0x429   : > { %2374 = vpow2.f32 %v2025_v18  ;;  %v2030_v6 = vmul.f32 -1.442695, %v1607_v3  ;;  %v1612_v58 = vmul.f32 %v2373_v52, %v3484_v44  ;;  %v2031_v53 = vmul.f32 -1.442695, %v1608_v15 }
 0x42a   : > { %2376 = vpow2.f32 %v2026_v61  ;;  %v1613_v30 = vmul.f32 %v2373_v52, %v3489_v27  ;;  %v2032_v29 = vmul.f32 -1.442695, %v1609_v23  ;;  %v1614_v24 = vmul.f32 %v2373_v52, %v3494_v55 }
 0x42b   : > { %2378 = vpow2.f32 %v2027_v17  ;;  %v2033_v41 = vmul.f32 -1.442695, %v1610_v22  ;;  %v1615_v32 = vmul.f32 %v2373_v52, %v3499_v13  ;;  %v2034_v9 = vmul.f32 -1.442695, %v1611_v21 }
 0x42c   : > { %2380 = vpow2.f32 %v2028_v5  ;;  %v1616_v4 = vmul.f32 %v2373_v52, %v3504_v46  ;;  %v2035_v7 = vmul.f32 -1.442695, %v1612_v58  ;;  %v2036_v44 = vmul.f32 -1.442695, %v1613_v30 }
 0x42d   : > { %2382 = vpow2.f32 %v2029_v43  ;;  %v2037_v25 = vmul.f32 -1.442695, %v1614_v24  ;;  %v2038_v27 = vmul.f32 -1.442695, %v1615_v32  ;;  %v2040_v55 = vmul.f32 -1.442695, %v1617_v26 }
 0x42e   : > { %2384 = vpow2.f32 %v2030_v6  ;;  %v2039_v28 = vmul.f32 -1.442695, %v1616_v4  ;;  %v2041_v48 = vmul.f32 -1.442695, %v1618_v19  ;;  %v2042_v13 = vmul.f32 -1.442695, %v1619_v57 }
 0x42f   : > { %2386 = vpow2.f32 %v2031_v53  ;;  %v2043_v46 = vmul.f32 -1.442695, %v1620_v34  ;;  %v2044_v0 = vmul.f32 -1.442695, %v1621_v31  ;;  %v2045_v38 = vmul.f32 -1.442695, %v1622_v63 }
 0x430   : > { %2388 = vpow2.f32 %v2032_v29  ;;  %v2046_v14 = vmul.f32 -1.442695, %v3539_v16  ;;  %v2047_v10 = vmul.f32 -1.442695, %v3541_v40  ;;  %v2048_v8 = vmul.f32 -1.442695, %v3543_v1 }
 0x431   : > { %2390 = vpow2.f32 %v2033_v41  ;;  %v2049_v62 = vmul.f32 -1.442695, %v3545_v59  ;;  %v2050_v45 = vmul.f32 -1.442695, %v3547_v12  ;;  %v2051_v26 = vmul.f32 -1.442695, %v3549_v11 }
 0x432   : > { %2392 = vpow2.f32 %v2034_v9  ;;  %v2052_v57 = vmul.f32 -1.442695, %v3551_v60  ;;  %v2053_v31 = vmul.f32 -1.442695, %v3553_v2  ;;  %v2054_v16 = vmul.f32 -1.442695, %v3555_v33 }
 0x433   : > { %2394 = vpow2.f32 %v2035_v7  ;;  %v2055_v1 = vmul.f32 -1.442695, %v3557_v51  ;;  %v2056_v12 = vmul.f32 -1.442695, %v3559_v50 }
 0x434   : > { %2396 = vpow2.f32 %v2036_v44 }
 0x435   : > { %2398 = vpow2.f32 %v2037_v25 }
 0x436   : > { %v2375_v35 = vpop.eup %2374  ;;  %2400 = vpow2.f32 %v2038_v27 }
 0x437   : > { %v2377_v49 = vpop.eup %2376  ;;  %2402 = vpow2.f32 %v2039_v28  ;;  %v1730_v15 = vadd.f32 1.0, %v2375_v35 }
 0x438   : > { %v2379_v47 = vpop.eup %2378  ;;  %2404 = vpow2.f32 %v2040_v55  ;;  %v1731_v18 = vadd.f32 1.0, %v2377_v49 }
 0x439   : > { %v2381_v20 = vpop.eup %2380  ;;  %2406 = vpow2.f32 %v2041_v48  ;;  %v1732_v2 = vadd.f32 1.0, %v2379_v47 }
 0x43a   : > { %v2383_v39 = vpop.eup %2382  ;;  %2408 = vpow2.f32 %v2042_v13  ;;  %v1733_v33 = vadd.f32 1.0, %v2381_v20 }
 0x43b   : > { %v2385_v56 = vpop.eup %2384  ;;  %2410 = vpow2.f32 %v2043_v46  ;;  %v1734_v5 = vadd.f32 1.0, %v2383_v39 }
 0x43c   : > { %v2387_v52 = vpop.eup %2386  ;;  %2412 = vpow2.f32 %v2044_v0  ;;  %v1735_v22 = vadd.f32 1.0, %v2385_v56 }
 0x43d   : > { %v2389_v42 = vpop.eup %2388  ;;  %2414 = vpow2.f32 %v2045_v38  ;;  %v1736_v50 = vadd.f32 1.0, %v2387_v52 }
 0x43e   : > { %v2391_v37 = vpop.eup %2390  ;;  %2416 = vpow2.f32 %v2046_v14  ;;  %v1737_v6 = vadd.f32 1.0, %v2389_v42 }
 0x43f   : > { %v2393_v3 = vpop.eup %2392  ;;  %2418 = vpow2.f32 %v2047_v10  ;;  %v1738_v53 = vadd.f32 1.0, %v2391_v37 }
 0x440   : > { %v2395_v19 = vpop.eup %2394  ;;  %2420 = vpow2.f32 %v2048_v8  ;;  %v1739_v29 = vadd.f32 1.0, %v2393_v3 }
 0x441   : > { %v2397_v34 = vpop.eup %2396  ;;  %2422 = vpow2.f32 %v2049_v62  ;;  %v1740_v41 = vadd.f32 1.0, %v2395_v19 }
 0x442   : > { %v2399_v63 = vpop.eup %2398  ;;  %2424 = vpow2.f32 %v2050_v45  ;;  %v1741_v9 = vadd.f32 1.0, %v2397_v34  ;;  %v2534_v45 = vld [vmem:[%s2629_s28 + $0x8] sm:$0xff]  ;;  %v2535_v34 = vld [vmem:[%s2629_s28 + $0x10] sm:$0xff] }
 0x443   : > { %v2401_v40 = vpop.eup %2400  ;;  %2426 = vpow2.f32 %v2051_v26  ;;  %v1742_v7 = vadd.f32 1.0, %v2399_v63 }
 0x444   : > { %v2403_v59 = vpop.eup %2402  ;;  %2428 = vpow2.f32 %v2052_v57  ;;  %v1743_v25 = vadd.f32 1.0, %v2401_v40  ;;  %v2536_v40 = vld [vmem:[%s2629_s28 + $0x18] sm:$0xff] }
 0x445   : > { %v2405_v11 = vpop.eup %2404  ;;  %2430 = vpow2.f32 %v2053_v31  ;;  %v1744_v28 = vadd.f32 1.0, %v2403_v59 }
 0x446   : > { %v2407_v60 = vpop.eup %2406  ;;  %2432 = vpow2.f32 %v2054_v16  ;;  %v1745_v48 = vadd.f32 1.0, %v2405_v11 }
 0x447   : > { %v2409_v61 = vpop.eup %2408  ;;  %2434 = vpow2.f32 %v2055_v1  ;;  %v1746_v13 = vadd.f32 1.0, %v2407_v60 }
 0x448   : > { %v2411_v17 = vpop.eup %2410  ;;  %2436 = vpow2.f32 %v2056_v12  ;;  %v1747_v46 = vadd.f32 1.0, %v2409_v61 }
 0x449   : > { %v2413_v23 = vpop.eup %2412  ;;  %2438 = vrcp.f32 %v1730_v15  ;;  %v1748_v0 = vadd.f32 1.0, %v2411_v17  ;;  %v2537_v15 = vld [vmem:[%s2629_s28 + $0x20] sm:$0xff]  ;;  %v2538_v17 = vld [vmem:[%s2629_s28 + $0x28] sm:$0xff] }
 0x44a   : > { %v2415_v51 = vpop.eup %2414  ;;  %2440 = vrcp.f32 %v1731_v18  ;;  %v1749_v39 = vadd.f32 1.0, %v2413_v23 }
 0x44b   : > { %v2417_v43 = vpop.eup %2416  ;;  %2442 = vrcp.f32 %v1732_v2  ;;  %v1750_v10 = vadd.f32 1.0, %v2415_v51 }
 0x44c   : > { %v2419_v21 = vpop.eup %2418  ;;  %2444 = vrcp.f32 %v1733_v33  ;;  %v1751_v62 = vadd.f32 1.0, %v2417_v43 }
 0x44d   : > { %v2421_v58 = vpop.eup %2420  ;;  %2446 = vrcp.f32 %v1734_v5  ;;  %v1752_v19 = vadd.f32 1.0, %v2419_v21 }
 0x44e   : > { %v2423_v30 = vpop.eup %2422  ;;  %2448 = vrcp.f32 %v1735_v22  ;;  %v1753_v63 = vadd.f32 1.0, %v2421_v58  ;;  %v2539_v22 = vld [vmem:[%s2629_s28 + $0x30] sm:$0xff]  ;;  %v2540_v58 = vld [vmem:[%s2629_s28 + $0x38] sm:$0xff] }
 0x44f   : > { %v3581_v24 = vpop.eup %2424  ;;  %2450 = vrcp.f32 %v1736_v50  ;;  %v1754_v12 = vadd.f32 1.0, %v2423_v30 }
 0x450   : > { %v3583_v32 = vpop.eup %2426  ;;  %2452 = vrcp.f32 %v1737_v6  ;;  %v1755_v61 = vadd.f32 1.0, %v3581_v24 }
 0x451   : > { %v3585_v4 = vpop.eup %2428  ;;  %2454 = vrcp.f32 %v1738_v53  ;;  %v1756_v5 = vadd.f32 1.0, %v3583_v32 }
 0x452   : > { %v3587_v44 = vpop.eup %2430  ;;  %2456 = vrcp.f32 %v1739_v29  ;;  %v1757_v21 = vadd.f32 1.0, %v3585_v4 }
 0x453   : > { %v3589_v27 = vpop.eup %2432  ;;  %2458 = vrcp.f32 %v1740_v41  ;;  %v1758_v29 = vadd.f32 1.0, %v3587_v44  ;;  %v2541_v41 = vld [vmem:[%s2629_s28 + $0x40] sm:$0xff] }
 0x454   : > { %v3591_v55 = vpop.eup %2434  ;;  %2460 = vrcp.f32 %v1741_v9  ;;  %v1759_v4 = vadd.f32 1.0, %v3589_v27 }
 0x455   : > { %v3593_v35 = vpop.eup %2436  ;;  %2462 = vrcp.f32 %v1742_v7 }
 0x456   : > { %v2439_v49 = vpop.eup %2438  ;;  %2464 = vrcp.f32 %v1743_v25  ;;  %v2542_v25 = vld [vmem:[%s2629_s28 + $0x48] sm:$0xff] }
 0x457   : > { %v2441_v47 = vpop.eup %2440  ;;  %2466 = vrcp.f32 %v1744_v28  ;;  %v1830_v20 = vadd.f32 %v2439_v49, %v3239_v36  ;;  %v2543_v49 = vld [vmem:[%s2629_s28 + $0x50] sm:$0xff] }
 0x458   : > { %v2443_v38 = vpop.eup %2442  ;;  %2468 = vrcp.f32 %v1745_v48  ;;  %v1831_v14 = vadd.f32 %v2441_v47, %v3239_v36  ;;  %v1760_v48 = vadd.f32 1.0, %v3591_v55  ;;  %v1761_v47 = vadd.f32 1.0, %v3593_v35 }
 0x459   : > { %v2445_v56 = vpop.eup %2444  ;;  %2470 = vrcp.f32 %v1746_v13  ;;  %v1832_v52 = vadd.f32 %v2443_v38, %v3239_v36  ;;  %v1862_v8 = vmul.f32 %v3216_v54, %v1830_v20  ;;  %v2544_v20 = vld [vmem:[%s2629_s28 + $0x58] sm:$0xff] }
 0x45a   : > { %v2447_v42 = vpop.eup %2446  ;;  %2472 = vrcp.f32 %v1747_v46  ;;  %v1833_v37 = vadd.f32 %v2445_v56, %v3239_v36  ;;  %v1863_v3 = vmul.f32 %v2534_v45, %v1831_v14  ;;  %v2545_v14 = vld [vmem:[%s2629_s28 + $0x60] sm:$0xff] }
 0x45b   : > { %v2449_v26 = vpop.eup %2448  ;;  %2474 = vrcp.f32 %v1748_v0  ;;  %v1834_v57 = vadd.f32 %v2447_v42, %v3239_v36  ;;  %v1864_v31 = vmul.f32 %v2535_v34, %v1832_v52  ;;  %1894 = vst.msk [vmem:[%s3601_s17] sm:$0xff] %vm238_vm0, %v1862_v8  ;;  %v2546_v52 = vld [vmem:[%s2629_s28 + $0x68] sm:$0xff] }
 0x45c   : > { %v2451_v54 = vpop.eup %2450  ;;  %2476 = vrcp.f32 %v1749_v39  ;;  %v1835_v16 = vadd.f32 %v2449_v26, %v3239_v36  ;;  %v1865_v1 = vmul.f32 %v2536_v40, %v1833_v37  ;;  %1895 = vst.msk [vmem:[%s3601_s17 + $0x8] sm:$0xff] %vm238_vm0, %v1863_v3  ;;  %v2547_v37 = vld [vmem:[%s2629_s28 + $0x70] sm:$0xff] }
 0x45d   : > { %v2453_v59 = vpop.eup %2452  ;;  %2478 = vrcp.f32 %v1750_v10  ;;  %v1836_v11 = vadd.f32 %v2451_v54, %v3239_v36  ;;  %v1866_v60 = vmul.f32 %v2537_v15, %v1834_v57  ;;  %1896 = vst.msk [vmem:[%s3601_s17 + $0x10] sm:$0xff] %vm238_vm0, %v1864_v31  ;;  %v2549_v54 = vld [vmem:[%s2629_s28 + $0x80] sm:$0xff]  ;;  %v2551_v15 = vld [vmem:[%s2629_s28 + $0x90] sm:$0xff] }
 0x45e   : > { %v2455_v18 = vpop.eup %2454  ;;  %2480 = vrcp.f32 %v1751_v62  ;;  %v1837_v2 = vadd.f32 %v2453_v59, %v3239_v36  ;;  %v1867_v33 = vmul.f32 %v2538_v17, %v1835_v16  ;;  %1897 = vst.msk [vmem:[%s3601_s17 + $0x18] sm:$0xff] %vm238_vm0, %v1865_v1  ;;  %v2550_v1 = vld [vmem:[%s2629_s28 + $0x88] sm:$0xff] }
 0x45f   : > { %v2457_v23 = vpop.eup %2456  ;;  %2482 = vrcp.f32 %v1752_v19  ;;  %v1838_v51 = vadd.f32 %v2455_v18, %v3239_v36  ;;  %v1868_v43 = vmul.f32 %v2539_v22, %v1836_v11  ;;  %1898 = vst.msk [vmem:[%s3601_s17 + $0x20] sm:$0xff] %vm238_vm0, %v1866_v60  ;;  %v2548_v19 = vld [vmem:[%s2629_s28 + $0x78] sm:$0xff] }
 0x460   : > { %v2459_v50 = vpop.eup %2458  ;;  %2484 = vrcp.f32 %v1753_v63  ;;  %v1839_v6 = vadd.f32 %v2457_v23, %v3239_v36  ;;  %v1869_v53 = vmul.f32 %v2540_v58, %v1837_v2  ;;  %1899 = vst.msk [vmem:[%s3601_s17 + $0x28] sm:$0xff] %vm238_vm0, %v1867_v33  ;;  %v2552_v2 = vld [vmem:[%s2629_s28 + $0x98] sm:$0xff] }
 0x461   : > { %v2461_v30 = vpop.eup %2460  ;;  %2486 = vrcp.f32 %v1754_v12  ;;  %v1840_v24 = vadd.f32 %v2459_v50, %v3239_v36  ;;  %v1870_v32 = vmul.f32 %v2541_v41, %v1838_v51  ;;  %1900 = vst.msk [vmem:[%s3601_s17 + $0x30] sm:$0xff] %vm238_vm0, %v1868_v43  ;;  %v2554_v50 = vld [vmem:[%s2629_s28 + $0xa8] sm:$0xff]  ;;  %v2556_v41 = vld [vmem:[%s2629_s28 + $0xb8] sm:$0xff] }
 0x462   : > { %v2463_v9 = vpop.eup %2462  ;;  %2488 = vrcp.f32 %v1755_v61  ;;  %v1841_v7 = vadd.f32 %v2461_v30, %v3239_v36  ;;  %v1871_v28 = vmul.f32 %v2542_v25, %v1839_v6  ;;  %1901 = vst.msk [vmem:[%s3601_s17 + $0x38] sm:$0xff] %vm238_vm0, %v1869_v53  ;;  %v2555_v53 = vld [vmem:[%s2629_s28 + $0xb0] sm:$0xff] }
 0x463   : > { %v2465_v44 = vpop.eup %2464  ;;  %2490 = vrcp.f32 %v1756_v5  ;;  %v1842_v13 = vadd.f32 %v2463_v9, %v3239_v36  ;;  %v1872_v46 = vmul.f32 %v2543_v49, %v1840_v24  ;;  %1902 = vst.msk [vmem:[%s3601_s17 + $0x40] sm:$0xff] %vm238_vm0, %v1870_v32  ;;  %v2553_v5 = vld [vmem:[%s2629_s28 + $0xa0] sm:$0xff] }
 0x464   : > { %v2467_v27 = vpop.eup %2466  ;;  %2492 = vrcp.f32 %v1757_v21  ;;  %v1843_v0 = vadd.f32 %v2465_v44, %v3239_v36  ;;  %v1873_v38 = vmul.f32 %v2544_v20, %v1841_v7  ;;  %1903 = vst.msk [vmem:[%s3601_s17 + $0x48] sm:$0xff] %vm238_vm0, %v1871_v28  ;;  %v2557_v7 = vld [vmem:[%s2629_s28 + $0xc0] sm:$0xff] }
 0x465   : > { %v2469_v55 = vpop.eup %2468  ;;  %2494 = vrcp.f32 %v1758_v29  ;;  %v1844_v39 = vadd.f32 %v2467_v27, %v3239_v36  ;;  %v1874_v56 = vmul.f32 %v2545_v14, %v1842_v13  ;;  %1904 = vst.msk [vmem:[%s3601_s17 + $0x50] sm:$0xff] %vm238_vm0, %v1872_v46  ;;  %v2559_v27 = vld [vmem:[%s2629_s28 + $0xd0] sm:$0xff] }
 0x466   : > { %v2471_v35 = vpop.eup %2470  ;;  %2496 = vrcp.f32 %v1759_v4  ;;  %v1845_v10 = vadd.f32 %v2469_v55, %v3239_v36  ;;  %v1875_v8 = vmul.f32 %v2546_v52, %v1843_v0  ;;  %1905 = vst.msk [vmem:[%s3601_s17 + $0x58] sm:$0xff] %vm238_vm0, %v1873_v38  ;;  %v2560_v38 = vld [vmem:[%s2629_s28 + $0xd8] sm:$0xff]  ;;  %v2562_v52 = vld [vmem:[%s2629_s28 + $0xe8] sm:$0xff] }
 0x467   : > { %v2473_v42 = vpop.eup %2472  ;;  %2498 = vrcp.f32 %v1760_v48  ;;  %v1846_v62 = vadd.f32 %v2471_v35, %v3239_v36  ;;  %v1876_v45 = vmul.f32 %v2547_v37, %v1844_v39  ;;  %1906 = vst.msk [vmem:[%s3601_s17 + $0x60] sm:$0xff] %vm238_vm0, %v1874_v56  ;;  %v2558_v48 = vld [vmem:[%s2629_s28 + $0xc8] sm:$0xff]  ;;  %v2561_v56 = vld [vmem:[%s2629_s28 + $0xe0] sm:$0xff]  ;;  %v2564_v37 = vld [vmem:[%s2629_s28 + $0xf8] sm:$0xff] }
 0x468   : > { %v2475_v3 = vpop.eup %2474  ;;  %2500 = vrcp.f32 %v1761_v47  ;;  %v1847_v26 = vadd.f32 %v2473_v42, %v3239_v36  ;;  %v1877_v57 = vmul.f32 %v2548_v19, %v1845_v10  ;;  %1907 = vst.msk [vmem:[%s3601_s17 + $0x68] sm:$0xff] %vm238_vm0, %v1875_v8  ;;  %v2563_v42 = vld [vmem:[%s2629_s28 + $0xf0] sm:$0xff] }
 0x469   : > { %v2477_v34 = vpop.eup %2476  ;;  %v1848_v31 = vadd.f32 %v2475_v3, %v3239_v36  ;;  %v1878_v63 = vmul.f32 %v2549_v54, %v1846_v62  ;;  %1908 = vst.msk [vmem:[%s3601_s17 + $0x70] sm:$0xff] %vm238_vm0, %v1876_v45 }
 0x46a   : > { %v2479_v16 = vpop.eup %2478  ;;  %v1849_v40 = vadd.f32 %v2477_v34, %v3239_v36  ;;  %v1879_v59 = vmul.f32 %v2550_v1, %v1847_v26  ;;  %1909 = vst.msk [vmem:[%s3601_s17 + $0x78] sm:$0xff] %vm238_vm0, %v1877_v57 }
 0x46b   : > { %v2481_v12 = vpop.eup %2480  ;;  %v1850_v11 = vadd.f32 %v2479_v16, %v3239_v36  ;;  %v1880_v60 = vmul.f32 %v2551_v15, %v1848_v31  ;;  %1910 = vst.msk [vmem:[%s3601_s17 + $0x80] sm:$0xff] %vm238_vm0, %v1878_v63 }
 0x46c   : > { %v2483_v18 = vpop.eup %2482  ;;  %v1851_v61 = vadd.f32 %v2481_v12, %v3239_v36  ;;  %v1881_v17 = vmul.f32 %v2552_v2, %v1849_v40  ;;  %1911 = vst.msk [vmem:[%s3601_s17 + $0x88] sm:$0xff] %vm238_vm0, %v1879_v59 }
 0x46d   : > { %v2485_v33 = vpop.eup %2484  ;;  %v1852_v23 = vadd.f32 %v2483_v18, %v3239_v36  ;;  %v1882_v51 = vmul.f32 %v2553_v5, %v1850_v11  ;;  %1912 = vst.msk [vmem:[%s3601_s17 + $0x90] sm:$0xff] %vm238_vm0, %v1880_v60 }
 0x46e   : > { %v2487_v22 = vpop.eup %2486  ;;  %v1853_v43 = vadd.f32 %v2485_v33, %v3239_v36  ;;  %v1883_v21 = vmul.f32 %v2554_v50, %v1851_v61  ;;  %1913 = vst.msk [vmem:[%s3601_s17 + $0x98] sm:$0xff] %vm238_vm0, %v1881_v17 }
 0x46f   : > { %v2489_v6 = vpop.eup %2488  ;;  %v1854_v58 = vadd.f32 %v2487_v22, %v3239_v36  ;;  %v1884_v30 = vmul.f32 %v2555_v53, %v1852_v23  ;;  %1914 = vst.msk [vmem:[%s3601_s17 + $0xa0] sm:$0xff] %vm238_vm0, %v1882_v51 }
 0x470   : > { %v2491_v29 = vpop.eup %2490  ;;  %v1855_v24 = vadd.f32 %v2489_v6, %v3239_v36  ;;  %v1885_v32 = vmul.f32 %v2556_v41, %v1853_v43  ;;  %1915 = vst.msk [vmem:[%s3601_s17 + $0xa8] sm:$0xff] %vm238_vm0, %v1883_v21 }
 0x471   : > { %v2493_v9 = vpop.eup %2492  ;;  %v1856_v4 = vadd.f32 %v2491_v29, %v3239_v36  ;;  %v1886_v25 = vmul.f32 %v2557_v7, %v1854_v58  ;;  %1916 = vst.msk [vmem:[%s3601_s17 + $0xb0] sm:$0xff] %vm238_vm0, %v1884_v30 }
 0x472   : > { %v2495_v28 = vpop.eup %2494  ;;  %v1857_v44 = vadd.f32 %v2493_v9, %v3239_v36  ;;  %v1887_v13 = vmul.f32 %v2558_v48, %v1855_v24  ;;  %1917 = vst.msk [vmem:[%s3601_s17 + $0xb8] sm:$0xff] %vm238_vm0, %v1885_v32 }
 0x473   : > { %v2497_v49 = vpop.eup %2496  ;;  %v1858_v46 = vadd.f32 %v2495_v28, %v3239_v36  ;;  %v1888_v47 = vmul.f32 %v2559_v27, %v1856_v4  ;;  %1918 = vst.msk [vmem:[%s3601_s17 + $0xc0] sm:$0xff] %vm238_vm0, %v1886_v25 }
 0x474   : > { %v2499_v0 = vpop.eup %2498  ;;  %v1859_v20 = vadd.f32 %v2497_v49, %v3239_v36  ;;  %v1889_v55 = vmul.f32 %v2560_v38, %v1857_v44  ;;  %1919 = vst.msk [vmem:[%s3601_s17 + $0xc8] sm:$0xff] %vm238_vm0, %v1887_v13 }
 0x475   : > { %v2501_v39 = vpop.eup %2500  ;;  %v1860_v14 = vadd.f32 %v2499_v0, %v3239_v36  ;;  %v1890_v35 = vmul.f32 %v2561_v56, %v1858_v46  ;;  %1920 = vst.msk [vmem:[%s3601_s17 + $0xd0] sm:$0xff] %vm238_vm0, %v1888_v47 }
 0x476   : > { %v1861_v10 = vadd.f32 %v2501_v39, %v3239_v36  ;;  %v1891_v8 = vmul.f32 %v2562_v52, %v1859_v20  ;;  %1921 = vst.msk [vmem:[%s3601_s17 + $0xd8] sm:$0xff] %vm238_vm0, %v1889_v55 }
 0x477   : > { %v1892_v62 = vmul.f32 %v2563_v42, %v1860_v14  ;;  %1922 = vst.msk [vmem:[%s3601_s17 + $0xe0] sm:$0xff] %vm238_vm0, %v1890_v35 }
 0x478   : > { %v1893_v45 = vmul.f32 %v2564_v37, %v1861_v10  ;;  %1923 = vst.msk [vmem:[%s3601_s17 + $0xe8] sm:$0xff] %vm238_vm0, %v1891_v8 }
 0x479   : > { %1924 = vst.msk [vmem:[%s3601_s17 + $0xf0] sm:$0xff] %vm238_vm0, %v1892_v62 }
 0x47a   : > { %1925 = vst.msk [vmem:[%s3601_s17 + $0xf8] sm:$0xff] %vm238_vm0, %v1893_v45 }
 0x47b PF: > { %s14_s15 = sadd.s32 1, %s2571_s15  }
 0x47c   : > { %p11_p4 = scmp.ge.s32.totalorder %s14_s15, 4  }
 0x47e   :  { %13 = sbr.rel (!%p11_p4) target bundleno = 1 (0x1), region = 66 }

</bundles_post_ra>
